<compile_context>
chip_gen: v7x
topology: tpu7x:2x2x1
jax: 0.10.0
libtpu: 0.0.40
codegen_flags: <defaults>
</compile_context>

<pallas_src>
import jax
import jax.numpy as jnp
from jax.experimental import pallas as pl
from jax.experimental.pallas import tpu as pltpu

# ---------------- model dimensions (small, BERT-like) ----------------
B = 2            # batch
S = 8            # sequence length
T = B * S        # flattened tokens
H = 32           # hidden size
NH = 4           # attention heads
HD = H // NH     # head dim
G = B * NH       # batched attention groups
FF = 64          # feed-forward intermediate size
VOCAB = 100
NUM_CLASSES = 4
LN_EPS = 1e-12
OUT_LANES = 128  # lane-dense logits store; sliced to NUM_CLASSES in the wrapper

# bias-slab row indices (one (12, 128) f32 slab holds every bias / LN param)
_R_EMB_G, _R_EMB_B = 0, 1
_R_BQKV = 2
_R_BO = 3
_R_LN1G, _R_LN1B = 4, 5
_R_BFF1, _R_BFF2 = 6, 7
_R_LN2G, _R_LN2B = 8, 9
_R_BP, _R_BC = 10, 11
_N_BIAS_ROWS = 12


# ------------------------------------------------------------------
# Fused kernel: embedding gather + LN + encoder layer + pooler + classifier
# ------------------------------------------------------------------
def bert_fused_kernel(ids_ref, emb_ref, w_qkv_ref, w_hh_ref, w_ff1_ref,
                      w_ff2_ref, w_cls_ref, bias_ref, logits_ref, x_scratch):
    f32 = jnp.float32
    bf16 = jnp.bfloat16

    def layernorm(z, g_row, b_row):
        g = bias_ref[g_row:g_row + 1, :H]
        b = bias_ref[b_row:b_row + 1, :H]
        mu = jnp.mean(z, axis=-1, keepdims=True)
        var = jnp.mean((z - mu) ** 2, axis=-1, keepdims=True)
        return (z - mu) * jax.lax.rsqrt(var + LN_EPS) * g + b

    # ---- in-kernel embedding gather (ids live in SMEM, tables in one VMEM slab) ----
    for t in range(T):
        tok = ids_ref[t]                      # word id
        seg = ids_ref[T + t]                  # segment id
        row = (emb_ref[pl.ds(tok, 1), :]
               + emb_ref[pl.ds(VOCAB + (t % S), 1), :]
               + emb_ref[pl.ds(VOCAB + S + seg, 1), :])
        x_scratch[pl.ds(t, 1), :] = row
    x = layernorm(x_scratch[...], _R_EMB_G, _R_EMB_B)                 # (T, H) f32

    # ---- additive attention mask from valid_length (SMEM scalars) ----
    kpos = jax.lax.broadcasted_iota(jnp.int32, (1, S), 1)             # (1, S)
    mask_rows = [jnp.where(kpos < ids_ref[2 * T + b], 0.0, -1e9).astype(f32)
                 for b in range(B)]
    add_mask = jnp.concatenate(mask_rows, axis=0)                     # (B, S)
    mask_g = jnp.broadcast_to(add_mask.reshape(B, 1, 1, S),
                              (B, NH, 1, S)).reshape(G, 1, S)         # (G, 1, S)

    # ---- fused QKV projection: one (T,H)@(H,3H) bf16 matmul ----
    qkv = jnp.dot(x.astype(bf16), w_qkv_ref[...],
                  preferred_element_type=f32) + bias_ref[_R_BQKV:_R_BQKV + 1, :3 * H]
    scale = 1.0 / (HD ** 0.5)
    q2 = qkv[:, 0:H] * scale                                          # (T, H)
    k2 = qkv[:, H:2 * H]
    v2 = qkv[:, 2 * H:3 * H]

    def to_heads(m):   # (T, H) -> (B*NH, S, HD) via static slices + stack
        return jnp.stack([m[b * S:(b + 1) * S, n * HD:(n + 1) * HD]
                          for b in range(B) for n in range(NH)], axis=0)

    qg, kg, vg = to_heads(q2), to_heads(k2), to_heads(v2)             # (G, S, HD)

    # ---- attention, batched over all B*NH groups (single softmax pass) ----
    s = jnp.einsum('gqd,gkd->gqk', qg, kg,
                   preferred_element_type=f32) + mask_g               # (G, S, S)
    smax = jnp.max(s, axis=-1, keepdims=True)
    p = jnp.exp(s - smax)
    denom = jnp.sum(p, axis=-1, keepdims=True)
    p = p * pl.reciprocal(denom, approx=True)                         # EUP slot
    ctx = jnp.einsum('gqk,gkd->gqd', p, vg,
                     preferred_element_type=f32)                      # (G, S, HD)

    # ---- relayout heads back to (T, H), single output-projection matmul ----
    ctx_flat = jnp.concatenate(
        [jnp.concatenate([ctx[b * NH + n] for n in range(NH)], axis=1)
         for b in range(B)], axis=0)                                  # (T, H)
    attn = jnp.dot(ctx_flat.astype(bf16), w_hh_ref[0],
                   preferred_element_type=f32) + bias_ref[_R_BO:_R_BO + 1, :H]
    x1 = layernorm(x + attn, _R_LN1G, _R_LN1B)                        # (T, H)

    # ---- feed-forward (flattened (T,·) matmuls) ----
    hdn = jnp.dot(x1.astype(bf16), w_ff1_ref[...],
                  preferred_element_type=f32) + bias_ref[_R_BFF1:_R_BFF1 + 1, :FF]
    # TODO(synk): PyTorch nn.GELU defaults to exact erf GELU; tanh approximation used here.
    hdn = jax.nn.gelu(hdn, approximate=True)
    ff = jnp.dot(hdn.astype(bf16), w_ff2_ref[...],
                 preferred_element_type=f32) + bias_ref[_R_BFF2:_R_BFF2 + 1, :H]
    x2 = layernorm(x1 + ff, _R_LN2G, _R_LN2B)                         # (T, H)

    # ---- pooler (tanh Linear on CLS rows) + classifier (lane-dense output) ----
    cls = jnp.concatenate([x2[b * S:b * S + 1, :] for b in range(B)], axis=0)  # (B, H)
    pooled = jnp.tanh(jnp.dot(cls.astype(bf16), w_hh_ref[1],
                              preferred_element_type=f32) + bias_ref[_R_BP:_R_BP + 1, :H])
    # TODO(synk): dropout(pooler) is identity at inference time (dr_rate=None / eval mode).
    logits_ref[...] = jnp.dot(pooled.astype(bf16), w_cls_ref[...],
                              preferred_element_type=f32) + bias_ref[_R_BC:_R_BC + 1, :]


# ------------------------------------------------------------------
# deterministic parameter init (synthetic "bert" + classifier)
# ------------------------------------------------------------------
def init_params(key):
    ks = jax.random.split(key, 12)

    def dense(k, shape):
        return 0.02 * jax.random.normal(k, shape, jnp.float32)

    return {
        "word_emb": dense(ks[0], (VOCAB, H)),
        "pos_emb": dense(ks[1], (S, H)),
        "seg_emb": dense(ks[2], (2, H)),
        "emb_ln_g": jnp.ones((1, H), jnp.float32),
        "emb_ln_b": jnp.zeros((1, H), jnp.float32),
        "wq": dense(ks[3], (H, H)), "bq": jnp.zeros((1, H), jnp.float32),
        "wk": dense(ks[4], (H, H)), "bk": jnp.zeros((1, H), jnp.float32),
        "wv": dense(ks[5], (H, H)), "bv": jnp.zeros((1, H), jnp.float32),
        "wo": dense(ks[6], (H, H)), "bo": jnp.zeros((1, H), jnp.float32),
        "ln1_g": jnp.ones((1, H), jnp.float32),
        "ln1_b": jnp.zeros((1, H), jnp.float32),
        "w_ff1": dense(ks[7], (H, FF)), "b_ff1": jnp.zeros((1, FF), jnp.float32),
        "w_ff2": dense(ks[8], (FF, H)), "b_ff2": jnp.zeros((1, H), jnp.float32),
        "ln2_g": jnp.ones((1, H), jnp.float32),
        "ln2_b": jnp.zeros((1, H), jnp.float32),
        "wp": dense(ks[9], (H, H)), "bp": jnp.zeros((1, H), jnp.float32),
        "wc": dense(ks[10], (H, NUM_CLASSES)),
        "bc": jnp.zeros((1, NUM_CLASSES), jnp.float32),
    }


# ------------------------------------------------------------------
# full forward: BERTClassifier.forward(token_ids, valid_length, segment_ids)
# ------------------------------------------------------------------
def bert_classifier_forward(params, token_ids, valid_length, segment_ids):
    f32 = jnp.float32
    bf16 = jnp.bfloat16

    # --- scalar ids packed for SMEM: [token_ids | segment_ids | valid_length] ---
    ids = jnp.concatenate([token_ids.reshape(-1), segment_ids.reshape(-1),
                           valid_length.reshape(-1)]).astype(jnp.int32)       # (2T+B,)

    # --- embedding tables stacked into one VMEM slab: [word | pos | seg] ---
    emb = jnp.concatenate([params["word_emb"], params["pos_emb"],
                           params["seg_emb"]], axis=0).astype(f32)            # (VOCAB+S+2, H)

    # --- weight slabs (bf16 matmul operands, f32 accumulation in-kernel) ---
    w_qkv = jnp.concatenate([params["wq"], params["wk"], params["wv"]],
                            axis=1).astype(bf16)                              # (H, 3H)
    w_hh = jnp.stack([params["wo"], params["wp"]], axis=0).astype(bf16)       # (2, H, H)
    w_ff1 = params["w_ff1"].astype(bf16)                                      # (H, FF)
    w_ff2 = params["w_ff2"].astype(bf16)                                      # (FF, H)
    w_cls = jnp.zeros((H, OUT_LANES), bf16).at[:, :NUM_CLASSES].set(
        params["wc"].astype(bf16))                                            # (H, 128)

    # --- every bias / LN param in one (12, 128) f32 slab ---
    def row(v):
        r = jnp.zeros((1, OUT_LANES), f32)
        return r.at[:, :v.shape[-1]].set(v.reshape(1, -1).astype(f32))

    bias = jnp.concatenate([
        row(params["emb_ln_g"]), row(params["emb_ln_b"]),
        row(jnp.concatenate([params["bq"], params["bk"], params["bv"]], axis=1)),
        row(params["bo"]),
        row(params["ln1_g"]), row(params["ln1_b"]),
        row(params["b_ff1"]), row(params["b_ff2"]),
        row(params["ln2_g"]), row(params["ln2_b"]),
        row(params["bp"]), row(params["bc"]),
    ], axis=0)                                                                # (12, 128)

    vmem = pltpu.MemorySpace.VMEM
    smem = pltpu.MemorySpace.SMEM
    logits_padded = pl.pallas_call(
        bert_fused_kernel,
        out_shape=jax.ShapeDtypeStruct((B, OUT_LANES), f32),
        in_specs=[pl.BlockSpec(memory_space=smem)]
                 + [pl.BlockSpec(memory_space=vmem)] * 7,
        out_specs=pl.BlockSpec(memory_space=vmem),
        scratch_shapes=[pltpu.VMEM((T, H), f32)],
    )(ids, emb, w_qkv, w_hh, w_ff1, w_ff2, w_cls, bias)

    return logits_padded[:, :NUM_CLASSES]


if __name__ == "__main__":
    key = jax.random.PRNGKey(0)
    k_params, k_tok, k_seg = jax.random.split(key, 3)

    params = init_params(k_params)
    token_ids = jax.random.randint(k_tok, (B, S), 0, VOCAB, dtype=jnp.int32)
    segment_ids = jax.random.randint(k_seg, (B, S), 0, 2, dtype=jnp.int32)
    valid_length = jnp.array([5, 8], dtype=jnp.int32)

    fwd = jax.jit(bert_classifier_forward)
    logits = fwd(params, token_ids, valid_length, segment_ids)
    jax.block_until_ready(logits)
    assert logits.shape == (B, NUM_CLASSES)
    print("KERNEL_OK")
</pallas_src>

<mosaic_0001>
module attributes {stable_mosaic.version = 11 : i64} {
  func.func @bert_fused_kernel(%arg0: memref<34xi32, #tpu.memory_space<smem>>, %arg1: memref<110x32xf32, #tpu.memory_space<vmem>>, %arg2: memref<32x96xbf16, #tpu.memory_space<vmem>>, %arg3: memref<2x32x32xbf16, #tpu.memory_space<vmem>>, %arg4: memref<32x64xbf16, #tpu.memory_space<vmem>>, %arg5: memref<64x32xbf16, #tpu.memory_space<vmem>>, %arg6: memref<32x128xbf16, #tpu.memory_space<vmem>>, %arg7: memref<12x128xf32, #tpu.memory_space<vmem>>, %arg8: memref<2x128xf32, #tpu.memory_space<vmem>>, %arg9: memref<16x32xf32, #tpu.memory_space<vmem>>) attributes {dimension_semantics = [], scalar_prefetch = 0 : i64, scratch_operands = 1 : i64, tpu.core_type = #tpu.core_type<tc>} {
    %c0 = arith.constant 0 : index
    %0 = memref.load %arg0[%c0] : memref<34xi32, #tpu.memory_space<smem>>
    %c16 = arith.constant 16 : index
    %1 = memref.load %arg0[%c16] : memref<34xi32, #tpu.memory_space<smem>>
    %2 = arith.index_cast %0 : i32 to index
    %c0_0 = arith.constant 0 : index
    %3 = vector.load %arg1[%2, %c0_0] : memref<110x32xf32, #tpu.memory_space<vmem>>, vector<1x32xf32>
    %c100 = arith.constant 100 : index
    %c0_1 = arith.constant 0 : index
    %4 = vector.load %arg1[%c100, %c0_1] : memref<110x32xf32, #tpu.memory_space<vmem>>, vector<1x32xf32>
    %5 = arith.addf %3, %4 : vector<1x32xf32>
    %c108_i32 = arith.constant 108 : i32
    %6 = arith.addi %c108_i32, %1 : i32
    %7 = arith.index_cast %6 : i32 to index
    %c0_2 = arith.constant 0 : index
    %8 = vector.load %arg1[%7, %c0_2] : memref<110x32xf32, #tpu.memory_space<vmem>>, vector<1x32xf32>
    %9 = arith.addf %5, %8 : vector<1x32xf32>
    %c0_3 = arith.constant 0 : index
    %c0_4 = arith.constant 0 : index
    %10 = vector.load %arg9[%c0_3, %c0_4] : memref<16x32xf32, #tpu.memory_space<vmem>>, vector<1x32xf32>
    tpu.vector_store %arg9[%c0_3, %c0_4], %9 {strides = array<i32>} : memref<16x32xf32, #tpu.memory_space<vmem>>, vector<1x32xf32>,
    %c1 = arith.constant 1 : index
    %11 = memref.load %arg0[%c1] : memref<34xi32, #tpu.memory_space<smem>>
    %c17 = arith.constant 17 : index
    %12 = memref.load %arg0[%c17] : memref<34xi32, #tpu.memory_space<smem>>
    %13 = arith.index_cast %11 : i32 to index
    %c0_5 = arith.constant 0 : index
    %14 = vector.load %arg1[%13, %c0_5] : memref<110x32xf32, #tpu.memory_space<vmem>>, vector<1x32xf32>
    %c101 = arith.constant 101 : index
    %c0_6 = arith.constant 0 : index
    %15 = vector.load %arg1[%c101, %c0_6] : memref<110x32xf32, #tpu.memory_space<vmem>>, vector<1x32xf32>
    %16 = arith.addf %14, %15 : vector<1x32xf32>
    %c108_i32_7 = arith.constant 108 : i32
    %17 = arith.addi %c108_i32_7, %12 : i32
    %18 = arith.index_cast %17 : i32 to index
    %c0_8 = arith.constant 0 : index
    %19 = vector.load %arg1[%18, %c0_8] : memref<110x32xf32, #tpu.memory_space<vmem>>, vector<1x32xf32>
    %20 = arith.addf %16, %19 : vector<1x32xf32>
    %c1_9 = arith.constant 1 : index
    %c0_10 = arith.constant 0 : index
    %21 = vector.load %arg9[%c1_9, %c0_10] : memref<16x32xf32, #tpu.memory_space<vmem>>, vector<1x32xf32>
    tpu.vector_store %arg9[%c1_9, %c0_10], %20 {strides = array<i32>} : memref<16x32xf32, #tpu.memory_space<vmem>>, vector<1x32xf32>,
    %c2 = arith.constant 2 : index
    %22 = memref.load %arg0[%c2] : memref<34xi32, #tpu.memory_space<smem>>
    %c18 = arith.constant 18 : index
    %23 = memref.load %arg0[%c18] : memref<34xi32, #tpu.memory_space<smem>>
    %24 = arith.index_cast %22 : i32 to index
    %c0_11 = arith.constant 0 : index
    %25 = vector.load %arg1[%24, %c0_11] : memref<110x32xf32, #tpu.memory_space<vmem>>, vector<1x32xf32>
    %c102 = arith.constant 102 : index
    %c0_12 = arith.constant 0 : index
    %26 = vector.load %arg1[%c102, %c0_12] : memref<110x32xf32, #tpu.memory_space<vmem>>, vector<1x32xf32>
    %27 = arith.addf %25, %26 : vector<1x32xf32>
    %c108_i32_13 = arith.constant 108 : i32
    %28 = arith.addi %c108_i32_13, %23 : i32
    %29 = arith.index_cast %28 : i32 to index
    %c0_14 = arith.constant 0 : index
    %30 = vector.load %arg1[%29, %c0_14] : memref<110x32xf32, #tpu.memory_space<vmem>>, vector<1x32xf32>
    %31 = arith.addf %27, %30 : vector<1x32xf32>
    %c2_15 = arith.constant 2 : index
    %c0_16 = arith.constant 0 : index
    %32 = vector.load %arg9[%c2_15, %c0_16] : memref<16x32xf32, #tpu.memory_space<vmem>>, vector<1x32xf32>
    tpu.vector_store %arg9[%c2_15, %c0_16], %31 {strides = array<i32>} : memref<16x32xf32, #tpu.memory_space<vmem>>, vector<1x32xf32>,
    %c3 = arith.constant 3 : index
    %33 = memref.load %arg0[%c3] : memref<34xi32, #tpu.memory_space<smem>>
    %c19 = arith.constant 19 : index
    %34 = memref.load %arg0[%c19] : memref<34xi32, #tpu.memory_space<smem>>
    %35 = arith.index_cast %33 : i32 to index
    %c0_17 = arith.constant 0 : index
    %36 = vector.load %arg1[%35, %c0_17] : memref<110x32xf32, #tpu.memory_space<vmem>>, vector<1x32xf32>
    %c103 = arith.constant 103 : index
    %c0_18 = arith.constant 0 : index
    %37 = vector.load %arg1[%c103, %c0_18] : memref<110x32xf32, #tpu.memory_space<vmem>>, vector<1x32xf32>
    %38 = arith.addf %36, %37 : vector<1x32xf32>
    %c108_i32_19 = arith.constant 108 : i32
    %39 = arith.addi %c108_i32_19, %34 : i32
    %40 = arith.index_cast %39 : i32 to index
    %c0_20 = arith.constant 0 : index
    %41 = vector.load %arg1[%40, %c0_20] : memref<110x32xf32, #tpu.memory_space<vmem>>, vector<1x32xf32>
    %42 = arith.addf %38, %41 : vector<1x32xf32>
    %c3_21 = arith.constant 3 : index
    %c0_22 = arith.constant 0 : index
    %43 = vector.load %arg9[%c3_21, %c0_22] : memref<16x32xf32, #tpu.memory_space<vmem>>, vector<1x32xf32>
    tpu.vector_store %arg9[%c3_21, %c0_22], %42 {strides = array<i32>} : memref<16x32xf32, #tpu.memory_space<vmem>>, vector<1x32xf32>,
    %c4 = arith.constant 4 : index
    %44 = memref.load %arg0[%c4] : memref<34xi32, #tpu.memory_space<smem>>
    %c20 = arith.constant 20 : index
    %45 = memref.load %arg0[%c20] : memref<34xi32, #tpu.memory_space<smem>>
    %46 = arith.index_cast %44 : i32 to index
    %c0_23 = arith.constant 0 : index
    %47 = vector.load %arg1[%46, %c0_23] : memref<110x32xf32, #tpu.memory_space<vmem>>, vector<1x32xf32>
    %c104 = arith.constant 104 : index
    %c0_24 = arith.constant 0 : index
    %48 = vector.load %arg1[%c104, %c0_24] : memref<110x32xf32, #tpu.memory_space<vmem>>, vector<1x32xf32>
    %49 = arith.addf %47, %48 : vector<1x32xf32>
    %c108_i32_25 = arith.constant 108 : i32
    %50 = arith.addi %c108_i32_25, %45 : i32
    %51 = arith.index_cast %50 : i32 to index
    %c0_26 = arith.constant 0 : index
    %52 = vector.load %arg1[%51, %c0_26] : memref<110x32xf32, #tpu.memory_space<vmem>>, vector<1x32xf32>
    %53 = arith.addf %49, %52 : vector<1x32xf32>
    %c4_27 = arith.constant 4 : index
    %c0_28 = arith.constant 0 : index
    %54 = vector.load %arg9[%c4_27, %c0_28] : memref<16x32xf32, #tpu.memory_space<vmem>>, vector<1x32xf32>
    tpu.vector_store %arg9[%c4_27, %c0_28], %53 {strides = array<i32>} : memref<16x32xf32, #tpu.memory_space<vmem>>, vector<1x32xf32>,
    %c5 = arith.constant 5 : index
    %55 = memref.load %arg0[%c5] : memref<34xi32, #tpu.memory_space<smem>>
    %c21 = arith.constant 21 : index
    %56 = memref.load %arg0[%c21] : memref<34xi32, #tpu.memory_space<smem>>
    %57 = arith.index_cast %55 : i32 to index
    %c0_29 = arith.constant 0 : index
    %58 = vector.load %arg1[%57, %c0_29] : memref<110x32xf32, #tpu.memory_space<vmem>>, vector<1x32xf32>
    %c105 = arith.constant 105 : index
    %c0_30 = arith.constant 0 : index
    %59 = vector.load %arg1[%c105, %c0_30] : memref<110x32xf32, #tpu.memory_space<vmem>>, vector<1x32xf32>
    %60 = arith.addf %58, %59 : vector<1x32xf32>
    %c108_i32_31 = arith.constant 108 : i32
    %61 = arith.addi %c108_i32_31, %56 : i32
    %62 = arith.index_cast %61 : i32 to index
    %c0_32 = arith.constant 0 : index
    %63 = vector.load %arg1[%62, %c0_32] : memref<110x32xf32, #tpu.memory_space<vmem>>, vector<1x32xf32>
    %64 = arith.addf %60, %63 : vector<1x32xf32>
    %c5_33 = arith.constant 5 : index
    %c0_34 = arith.constant 0 : index
    %65 = vector.load %arg9[%c5_33, %c0_34] : memref<16x32xf32, #tpu.memory_space<vmem>>, vector<1x32xf32>
    tpu.vector_store %arg9[%c5_33, %c0_34], %64 {strides = array<i32>} : memref<16x32xf32, #tpu.memory_space<vmem>>, vector<1x32xf32>,
    %c6 = arith.constant 6 : index
    %66 = memref.load %arg0[%c6] : memref<34xi32, #tpu.memory_space<smem>>
    %c22 = arith.constant 22 : index
    %67 = memref.load %arg0[%c22] : memref<34xi32, #tpu.memory_space<smem>>
    %68 = arith.index_cast %66 : i32 to index
    %c0_35 = arith.constant 0 : index
    %69 = vector.load %arg1[%68, %c0_35] : memref<110x32xf32, #tpu.memory_space<vmem>>, vector<1x32xf32>
    %c106 = arith.constant 106 : index
    %c0_36 = arith.constant 0 : index
    %70 = vector.load %arg1[%c106, %c0_36] : memref<110x32xf32, #tpu.memory_space<vmem>>, vector<1x32xf32>
    %71 = arith.addf %69, %70 : vector<1x32xf32>
    %c108_i32_37 = arith.constant 108 : i32
    %72 = arith.addi %c108_i32_37, %67 : i32
    %73 = arith.index_cast %72 : i32 to index
    %c0_38 = arith.constant 0 : index
    %74 = vector.load %arg1[%73, %c0_38] : memref<110x32xf32, #tpu.memory_space<vmem>>, vector<1x32xf32>
    %75 = arith.addf %71, %74 : vector<1x32xf32>
    %c6_39 = arith.constant 6 : index
    %c0_40 = arith.constant 0 : index
    %76 = vector.load %arg9[%c6_39, %c0_40] : memref<16x32xf32, #tpu.memory_space<vmem>>, vector<1x32xf32>
    tpu.vector_store %arg9[%c6_39, %c0_40], %75 {strides = array<i32>} : memref<16x32xf32, #tpu.memory_space<vmem>>, vector<1x32xf32>,
    %c7 = arith.constant 7 : index
    %77 = memref.load %arg0[%c7] : memref<34xi32, #tpu.memory_space<smem>>
    %c23 = arith.constant 23 : index
    %78 = memref.load %arg0[%c23] : memref<34xi32, #tpu.memory_space<smem>>
    %79 = arith.index_cast %77 : i32 to index
    %c0_41 = arith.constant 0 : index
    %80 = vector.load %arg1[%79, %c0_41] : memref<110x32xf32, #tpu.memory_space<vmem>>, vector<1x32xf32>
    %c107 = arith.constant 107 : index
    %c0_42 = arith.constant 0 : index
    %81 = vector.load %arg1[%c107, %c0_42] : memref<110x32xf32, #tpu.memory_space<vmem>>, vector<1x32xf32>
    %82 = arith.addf %80, %81 : vector<1x32xf32>
    %c108_i32_43 = arith.constant 108 : i32
    %83 = arith.addi %c108_i32_43, %78 : i32
    %84 = arith.index_cast %83 : i32 to index
    %c0_44 = arith.constant 0 : index
    %85 = vector.load %arg1[%84, %c0_44] : memref<110x32xf32, #tpu.memory_space<vmem>>, vector<1x32xf32>
    %86 = arith.addf %82, %85 : vector<1x32xf32>
    %c7_45 = arith.constant 7 : index
    %c0_46 = arith.constant 0 : index
    %87 = vector.load %arg9[%c7_45, %c0_46] : memref<16x32xf32, #tpu.memory_space<vmem>>, vector<1x32xf32>
    tpu.vector_store %arg9[%c7_45, %c0_46], %86 {strides = array<i32>} : memref<16x32xf32, #tpu.memory_space<vmem>>, vector<1x32xf32>,
    %c8 = arith.constant 8 : index
    %88 = memref.load %arg0[%c8] : memref<34xi32, #tpu.memory_space<smem>>
    %c24 = arith.constant 24 : index
    %89 = memref.load %arg0[%c24] : memref<34xi32, #tpu.memory_space<smem>>
    %90 = arith.index_cast %88 : i32 to index
    %c0_47 = arith.constant 0 : index
    %91 = vector.load %arg1[%90, %c0_47] : memref<110x32xf32, #tpu.memory_space<vmem>>, vector<1x32xf32>
    %c100_48 = arith.constant 100 : index
    %c0_49 = arith.constant 0 : index
    %92 = vector.load %arg1[%c100_48, %c0_49] : memref<110x32xf32, #tpu.memory_space<vmem>>, vector<1x32xf32>
    %93 = arith.addf %91, %92 : vector<1x32xf32>
    %c108_i32_50 = arith.constant 108 : i32
    %94 = arith.addi %c108_i32_50, %89 : i32
    %95 = arith.index_cast %94 : i32 to index
    %c0_51 = arith.constant 0 : index
    %96 = vector.load %arg1[%95, %c0_51] : memref<110x32xf32, #tpu.memory_space<vmem>>, vector<1x32xf32>
    %97 = arith.addf %93, %96 : vector<1x32xf32>
    %c8_52 = arith.constant 8 : index
    %c0_53 = arith.constant 0 : index
    %98 = vector.load %arg9[%c8_52, %c0_53] : memref<16x32xf32, #tpu.memory_space<vmem>>, vector<1x32xf32>
    tpu.vector_store %arg9[%c8_52, %c0_53], %97 {strides = array<i32>} : memref<16x32xf32, #tpu.memory_space<vmem>>, vector<1x32xf32>,
    %c9 = arith.constant 9 : index
    %99 = memref.load %arg0[%c9] : memref<34xi32, #tpu.memory_space<smem>>
    %c25 = arith.constant 25 : index
    %100 = memref.load %arg0[%c25] : memref<34xi32, #tpu.memory_space<smem>>
    %101 = arith.index_cast %99 : i32 to index
    %c0_54 = arith.constant 0 : index
    %102 = vector.load %arg1[%101, %c0_54] : memref<110x32xf32, #tpu.memory_space<vmem>>, vector<1x32xf32>
    %c101_55 = arith.constant 101 : index
    %c0_56 = arith.constant 0 : index
    %103 = vector.load %arg1[%c101_55, %c0_56] : memref<110x32xf32, #tpu.memory_space<vmem>>, vector<1x32xf32>
    %104 = arith.addf %102, %103 : vector<1x32xf32>
    %c108_i32_57 = arith.constant 108 : i32
    %105 = arith.addi %c108_i32_57, %100 : i32
    %106 = arith.index_cast %105 : i32 to index
    %c0_58 = arith.constant 0 : index
    %107 = vector.load %arg1[%106, %c0_58] : memref<110x32xf32, #tpu.memory_space<vmem>>, vector<1x32xf32>
    %108 = arith.addf %104, %107 : vector<1x32xf32>
    %c9_59 = arith.constant 9 : index
    %c0_60 = arith.constant 0 : index
    %109 = vector.load %arg9[%c9_59, %c0_60] : memref<16x32xf32, #tpu.memory_space<vmem>>, vector<1x32xf32>
    tpu.vector_store %arg9[%c9_59, %c0_60], %108 {strides = array<i32>} : memref<16x32xf32, #tpu.memory_space<vmem>>, vector<1x32xf32>,
    %c10 = arith.constant 10 : index
    %110 = memref.load %arg0[%c10] : memref<34xi32, #tpu.memory_space<smem>>
    %c26 = arith.constant 26 : index
    %111 = memref.load %arg0[%c26] : memref<34xi32, #tpu.memory_space<smem>>
    %112 = arith.index_cast %110 : i32 to index
    %c0_61 = arith.constant 0 : index
    %113 = vector.load %arg1[%112, %c0_61] : memref<110x32xf32, #tpu.memory_space<vmem>>, vector<1x32xf32>
    %c102_62 = arith.constant 102 : index
    %c0_63 = arith.constant 0 : index
    %114 = vector.load %arg1[%c102_62, %c0_63] : memref<110x32xf32, #tpu.memory_space<vmem>>, vector<1x32xf32>
    %115 = arith.addf %113, %114 : vector<1x32xf32>
    %c108_i32_64 = arith.constant 108 : i32
    %116 = arith.addi %c108_i32_64, %111 : i32
    %117 = arith.index_cast %116 : i32 to index
    %c0_65 = arith.constant 0 : index
    %118 = vector.load %arg1[%117, %c0_65] : memref<110x32xf32, #tpu.memory_space<vmem>>, vector<1x32xf32>
    %119 = arith.addf %115, %118 : vector<1x32xf32>
    %c10_66 = arith.constant 10 : index
    %c0_67 = arith.constant 0 : index
    %120 = vector.load %arg9[%c10_66, %c0_67] : memref<16x32xf32, #tpu.memory_space<vmem>>, vector<1x32xf32>
    tpu.vector_store %arg9[%c10_66, %c0_67], %119 {strides = array<i32>} : memref<16x32xf32, #tpu.memory_space<vmem>>, vector<1x32xf32>,
    %c11 = arith.constant 11 : index
    %121 = memref.load %arg0[%c11] : memref<34xi32, #tpu.memory_space<smem>>
    %c27 = arith.constant 27 : index
    %122 = memref.load %arg0[%c27] : memref<34xi32, #tpu.memory_space<smem>>
    %123 = arith.index_cast %121 : i32 to index
    %c0_68 = arith.constant 0 : index
    %124 = vector.load %arg1[%123, %c0_68] : memref<110x32xf32, #tpu.memory_space<vmem>>, vector<1x32xf32>
    %c103_69 = arith.constant 103 : index
    %c0_70 = arith.constant 0 : index
    %125 = vector.load %arg1[%c103_69, %c0_70] : memref<110x32xf32, #tpu.memory_space<vmem>>, vector<1x32xf32>
    %126 = arith.addf %124, %125 : vector<1x32xf32>
    %c108_i32_71 = arith.constant 108 : i32
    %127 = arith.addi %c108_i32_71, %122 : i32
    %128 = arith.index_cast %127 : i32 to index
    %c0_72 = arith.constant 0 : index
    %129 = vector.load %arg1[%128, %c0_72] : memref<110x32xf32, #tpu.memory_space<vmem>>, vector<1x32xf32>
    %130 = arith.addf %126, %129 : vector<1x32xf32>
    %c11_73 = arith.constant 11 : index
    %c0_74 = arith.constant 0 : index
    %131 = vector.load %arg9[%c11_73, %c0_74] : memref<16x32xf32, #tpu.memory_space<vmem>>, vector<1x32xf32>
    tpu.vector_store %arg9[%c11_73, %c0_74], %130 {strides = array<i32>} : memref<16x32xf32, #tpu.memory_space<vmem>>, vector<1x32xf32>,
    %c12 = arith.constant 12 : index
    %132 = memref.load %arg0[%c12] : memref<34xi32, #tpu.memory_space<smem>>
    %c28 = arith.constant 28 : index
    %133 = memref.load %arg0[%c28] : memref<34xi32, #tpu.memory_space<smem>>
    %134 = arith.index_cast %132 : i32 to index
    %c0_75 = arith.constant 0 : index
    %135 = vector.load %arg1[%134, %c0_75] : memref<110x32xf32, #tpu.memory_space<vmem>>, vector<1x32xf32>
    %c104_76 = arith.constant 104 : index
    %c0_77 = arith.constant 0 : index
    %136 = vector.load %arg1[%c104_76, %c0_77] : memref<110x32xf32, #tpu.memory_space<vmem>>, vector<1x32xf32>
    %137 = arith.addf %135, %136 : vector<1x32xf32>
    %c108_i32_78 = arith.constant 108 : i32
    %138 = arith.addi %c108_i32_78, %133 : i32
    %139 = arith.index_cast %138 : i32 to index
    %c0_79 = arith.constant 0 : index
    %140 = vector.load %arg1[%139, %c0_79] : memref<110x32xf32, #tpu.memory_space<vmem>>, vector<1x32xf32>
    %141 = arith.addf %137, %140 : vector<1x32xf32>
    %c12_80 = arith.constant 12 : index
    %c0_81 = arith.constant 0 : index
    %142 = vector.load %arg9[%c12_80, %c0_81] : memref<16x32xf32, #tpu.memory_space<vmem>>, vector<1x32xf32>
    tpu.vector_store %arg9[%c12_80, %c0_81], %141 {strides = array<i32>} : memref<16x32xf32, #tpu.memory_space<vmem>>, vector<1x32xf32>,
    %c13 = arith.constant 13 : index
    %143 = memref.load %arg0[%c13] : memref<34xi32, #tpu.memory_space<smem>>
    %c29 = arith.constant 29 : index
    %144 = memref.load %arg0[%c29] : memref<34xi32, #tpu.memory_space<smem>>
    %145 = arith.index_cast %143 : i32 to index
    %c0_82 = arith.constant 0 : index
    %146 = vector.load %arg1[%145, %c0_82] : memref<110x32xf32, #tpu.memory_space<vmem>>, vector<1x32xf32>
    %c105_83 = arith.constant 105 : index
    %c0_84 = arith.constant 0 : index
    %147 = vector.load %arg1[%c105_83, %c0_84] : memref<110x32xf32, #tpu.memory_space<vmem>>, vector<1x32xf32>
    %148 = arith.addf %146, %147 : vector<1x32xf32>
    %c108_i32_85 = arith.constant 108 : i32
    %149 = arith.addi %c108_i32_85, %144 : i32
    %150 = arith.index_cast %149 : i32 to index
    %c0_86 = arith.constant 0 : index
    %151 = vector.load %arg1[%150, %c0_86] : memref<110x32xf32, #tpu.memory_space<vmem>>, vector<1x32xf32>
    %152 = arith.addf %148, %151 : vector<1x32xf32>
    %c13_87 = arith.constant 13 : index
    %c0_88 = arith.constant 0 : index
    %153 = vector.load %arg9[%c13_87, %c0_88] : memref<16x32xf32, #tpu.memory_space<vmem>>, vector<1x32xf32>
    tpu.vector_store %arg9[%c13_87, %c0_88], %152 {strides = array<i32>} : memref<16x32xf32, #tpu.memory_space<vmem>>, vector<1x32xf32>,
    %c14 = arith.constant 14 : index
    %154 = memref.load %arg0[%c14] : memref<34xi32, #tpu.memory_space<smem>>
    %c30 = arith.constant 30 : index
    %155 = memref.load %arg0[%c30] : memref<34xi32, #tpu.memory_space<smem>>
    %156 = arith.index_cast %154 : i32 to index
    %c0_89 = arith.constant 0 : index
    %157 = vector.load %arg1[%156, %c0_89] : memref<110x32xf32, #tpu.memory_space<vmem>>, vector<1x32xf32>
    %c106_90 = arith.constant 106 : index
    %c0_91 = arith.constant 0 : index
    %158 = vector.load %arg1[%c106_90, %c0_91] : memref<110x32xf32, #tpu.memory_space<vmem>>, vector<1x32xf32>
    %159 = arith.addf %157, %158 : vector<1x32xf32>
    %c108_i32_92 = arith.constant 108 : i32
    %160 = arith.addi %c108_i32_92, %155 : i32
    %161 = arith.index_cast %160 : i32 to index
    %c0_93 = arith.constant 0 : index
    %162 = vector.load %arg1[%161, %c0_93] : memref<110x32xf32, #tpu.memory_space<vmem>>, vector<1x32xf32>
    %163 = arith.addf %159, %162 : vector<1x32xf32>
    %c14_94 = arith.constant 14 : index
    %c0_95 = arith.constant 0 : index
    %164 = vector.load %arg9[%c14_94, %c0_95] : memref<16x32xf32, #tpu.memory_space<vmem>>, vector<1x32xf32>
    tpu.vector_store %arg9[%c14_94, %c0_95], %163 {strides = array<i32>} : memref<16x32xf32, #tpu.memory_space<vmem>>, vector<1x32xf32>,
    %c15 = arith.constant 15 : index
    %165 = memref.load %arg0[%c15] : memref<34xi32, #tpu.memory_space<smem>>
    %c31 = arith.constant 31 : index
    %166 = memref.load %arg0[%c31] : memref<34xi32, #tpu.memory_space<smem>>
    %167 = arith.index_cast %165 : i32 to index
    %c0_96 = arith.constant 0 : index
    %168 = vector.load %arg1[%167, %c0_96] : memref<110x32xf32, #tpu.memory_space<vmem>>, vector<1x32xf32>
    %c107_97 = arith.constant 107 : index
    %c0_98 = arith.constant 0 : index
    %169 = vector.load %arg1[%c107_97, %c0_98] : memref<110x32xf32, #tpu.memory_space<vmem>>, vector<1x32xf32>
    %170 = arith.addf %168, %169 : vector<1x32xf32>
    %c108_i32_99 = arith.constant 108 : i32
    %171 = arith.addi %c108_i32_99, %166 : i32
    %172 = arith.index_cast %171 : i32 to index
    %c0_100 = arith.constant 0 : index
    %173 = vector.load %arg1[%172, %c0_100] : memref<110x32xf32, #tpu.memory_space<vmem>>, vector<1x32xf32>
    %174 = arith.addf %170, %173 : vector<1x32xf32>
    %c15_101 = arith.constant 15 : index
    %c0_102 = arith.constant 0 : index
    %175 = vector.load %arg9[%c15_101, %c0_102] : memref<16x32xf32, #tpu.memory_space<vmem>>, vector<1x32xf32>
    tpu.vector_store %arg9[%c15_101, %c0_102], %174 {strides = array<i32>} : memref<16x32xf32, #tpu.memory_space<vmem>>, vector<1x32xf32>,
    %c0_103 = arith.constant 0 : index
    %c0_104 = arith.constant 0 : index
    %176 = vector.load %arg9[%c0_103, %c0_104] : memref<16x32xf32, #tpu.memory_space<vmem>>, vector<16x32xf32>
    %c0_105 = arith.constant 0 : index
    %c0_106 = arith.constant 0 : index
    %177 = vector.load %arg7[%c0_105, %c0_106] : memref<12x128xf32, #tpu.memory_space<vmem>>, vector<1x32xf32>
    %c1_107 = arith.constant 1 : index
    %c0_108 = arith.constant 0 : index
    %178 = vector.load %arg7[%c1_107, %c0_108] : memref<12x128xf32, #tpu.memory_space<vmem>>, vector<1x32xf32>
    %cst = arith.constant dense<0.000000e+00> : vector<16xf32>
    %179 = vector.multi_reduction <add>, %176, %cst [1] : vector<16x32xf32> to vector<16xf32>
    %180 = vector.shape_cast %179 : vector<16xf32> to vector<16x1xf32>
    %cst_109 = arith.constant 3.200000e+01 : f32
    %181 = vector.broadcast %cst_109 : f32 to vector<16x1xf32>
    %182 = arith.divf %180, %181 : vector<16x1xf32>
    %183 = vector.broadcast %182 : vector<16x1xf32> to vector<16x32xf32>
    %184 = arith.subf %176, %183 : vector<16x32xf32>
    %185 = arith.mulf %184, %184 : vector<16x32xf32>
    %cst_110 = arith.constant dense<0.000000e+00> : vector<16xf32>
    %186 = vector.multi_reduction <add>, %185, %cst_110 [1] : vector<16x32xf32> to vector<16xf32>
    %187 = vector.shape_cast %186 : vector<16xf32> to vector<16x1xf32>
    %cst_111 = arith.constant 3.200000e+01 : f32
    %188 = vector.broadcast %cst_111 : f32 to vector<16x1xf32>
    %189 = arith.divf %187, %188 : vector<16x1xf32>
    %190 = vector.broadcast %182 : vector<16x1xf32> to vector<16x32xf32>
    %191 = arith.subf %176, %190 : vector<16x32xf32>
    %cst_112 = arith.constant 9.99999996E-13 : f32
    %192 = vector.broadcast %cst_112 : f32 to vector<16x1xf32>
    %193 = arith.addf %189, %192 : vector<16x1xf32>
    %194 = math.rsqrt %193 : vector<16x1xf32>
    %195 = vector.broadcast %194 : vector<16x1xf32> to vector<16x32xf32>
    %196 = arith.mulf %191, %195 : vector<16x32xf32>
    %197 = vector.broadcast %177 : vector<1x32xf32> to vector<16x32xf32>
    %198 = arith.mulf %196, %197 : vector<16x32xf32>
    %199 = vector.broadcast %178 : vector<1x32xf32> to vector<16x32xf32>
    %200 = arith.addf %198, %199 : vector<16x32xf32>
    %201 = tpu.iota {dimensions = array<i32: 1>} : vector<1x8xi32>
    %c32 = arith.constant 32 : index
    %202 = memref.load %arg0[%c32] : memref<34xi32, #tpu.memory_space<smem>>
    %203 = vector.broadcast %202 : i32 to vector<1x8xi32>
    %204 = arith.cmpi slt, %201, %203 : vector<1x8xi32>
    %cst_113 = arith.constant 0.000000e+00 : f32
    %cst_114 = arith.constant -1.000000e+09 : f32
    %205 = vector.broadcast %cst_113 : f32 to vector<1x8xf32>
    %206 = vector.broadcast %cst_114 : f32 to vector<1x8xf32>
    %207 = arith.select %204, %205, %206 : vector<1x8xi1>, vector<1x8xf32>
    %c33 = arith.constant 33 : index
    %208 = memref.load %arg0[%c33] : memref<34xi32, #tpu.memory_space<smem>>
    %209 = vector.broadcast %208 : i32 to vector<1x8xi32>
    %210 = arith.cmpi slt, %201, %209 : vector<1x8xi32>
    %cst_115 = arith.constant 0.000000e+00 : f32
    %cst_116 = arith.constant -1.000000e+09 : f32
    %211 = vector.broadcast %cst_115 : f32 to vector<1x8xf32>
    %212 = vector.broadcast %cst_116 : f32 to vector<1x8xf32>
    %213 = arith.select %210, %211, %212 : vector<1x8xi1>, vector<1x8xf32>
    %214 = tpu.concatenate %207, %213 in 0 : vector<1x8xf32>, vector<1x8xf32> -> vector<2x8xf32>
    %215 = vector.shape_cast %214 : vector<2x8xf32> to vector<2x1x1x8xf32>
    %216 = vector.shape_cast %215 : vector<2x1x1x8xf32> to vector<2x1x1x8xf32>
    %217 = vector.broadcast %216 : vector<2x1x1x8xf32> to vector<2x4x1x8xf32>
    %218 = vector.shape_cast %217 : vector<2x4x1x8xf32> to vector<8x1x8xf32>
    %219 = arith.truncf %200 : vector<16x32xf32> to vector<16x32xbf16>
    %c0_117 = arith.constant 0 : index
    %c0_118 = arith.constant 0 : index
    %220 = vector.load %arg2[%c0_117, %c0_118] : memref<32x96xbf16, #tpu.memory_space<vmem>>, vector<32x96xbf16>
    %cst_119 = arith.constant dense<0.000000e+00> : vector<16x96xf32>
    %221 = tpu.matmul %219, %220, %cst_119 {dimension_numbers = #tpu.dot_dimension_numbers<[1], [0], [0], [1], [0, 0, 1, 1], [], []>} : vector<16x32xbf16>, vector<32x96xbf16>, vector<16x96xf32> -> vector<16x96xf32>
    %c2_120 = arith.constant 2 : index
    %c0_121 = arith.constant 0 : index
    %222 = vector.load %arg7[%c2_120, %c0_121] : memref<12x128xf32, #tpu.memory_space<vmem>>, vector<1x96xf32>
    %223 = vector.broadcast %222 : vector<1x96xf32> to vector<16x96xf32>
    %224 = arith.addf %221, %223 : vector<16x96xf32>
    %225 = vector.extract_strided_slice %224 {offsets = [0, 0], sizes = [16, 32], strides = [1, 1]} : vector<16x96xf32> to vector<16x32xf32>
    %cst_122 = arith.constant 0.353553385 : f32
    %226 = vector.broadcast %cst_122 : f32 to vector<16x32xf32>
    %227 = arith.mulf %225, %226 : vector<16x32xf32>
    %228 = vector.extract_strided_slice %224 {offsets = [0, 32], sizes = [16, 32], strides = [1, 1]} : vector<16x96xf32> to vector<16x32xf32>
    %229 = vector.extract_strided_slice %224 {offsets = [0, 64], sizes = [16, 32], strides = [1, 1]} : vector<16x96xf32> to vector<16x32xf32>
    %230 = vector.extract_strided_slice %227 {offsets = [0, 0], sizes = [8, 8], strides = [1, 1]} : vector<16x32xf32> to vector<8x8xf32>
    %231 = vector.extract_strided_slice %227 {offsets = [0, 8], sizes = [8, 8], strides = [1, 1]} : vector<16x32xf32> to vector<8x8xf32>
    %232 = vector.extract_strided_slice %227 {offsets = [0, 16], sizes = [8, 8], strides = [1, 1]} : vector<16x32xf32> to vector<8x8xf32>
    %233 = vector.extract_strided_slice %227 {offsets = [0, 24], sizes = [8, 8], strides = [1, 1]} : vector<16x32xf32> to vector<8x8xf32>
    %234 = vector.extract_strided_slice %227 {offsets = [8, 0], sizes = [8, 8], strides = [1, 1]} : vector<16x32xf32> to vector<8x8xf32>
    %235 = vector.extract_strided_slice %227 {offsets = [8, 8], sizes = [8, 8], strides = [1, 1]} : vector<16x32xf32> to vector<8x8xf32>
    %236 = vector.extract_strided_slice %227 {offsets = [8, 16], sizes = [8, 8], strides = [1, 1]} : vector<16x32xf32> to vector<8x8xf32>
    %237 = vector.extract_strided_slice %227 {offsets = [8, 24], sizes = [8, 8], strides = [1, 1]} : vector<16x32xf32> to vector<8x8xf32>
    %238 = vector.shape_cast %230 : vector<8x8xf32> to vector<1x8x8xf32>
    %239 = vector.shape_cast %231 : vector<8x8xf32> to vector<1x8x8xf32>
    %240 = vector.shape_cast %232 : vector<8x8xf32> to vector<1x8x8xf32>
    %241 = vector.shape_cast %233 : vector<8x8xf32> to vector<1x8x8xf32>
    %242 = vector.shape_cast %234 : vector<8x8xf32> to vector<1x8x8xf32>
    %243 = vector.shape_cast %235 : vector<8x8xf32> to vector<1x8x8xf32>
    %244 = vector.shape_cast %236 : vector<8x8xf32> to vector<1x8x8xf32>
    %245 = vector.shape_cast %237 : vector<8x8xf32> to vector<1x8x8xf32>
    %246 = tpu.concatenate %238, %239, %240, %241, %242, %243, %244, %245 in 0 : vector<1x8x8xf32>, vector<1x8x8xf32>, vector<1x8x8xf32>, vector<1x8x8xf32>, vector<1x8x8xf32>, vector<1x8x8xf32>, vector<1x8x8xf32>, vector<1x8x8xf32> -> vector<8x8x8xf32>
    %247 = vector.extract_strided_slice %228 {offsets = [0, 0], sizes = [8, 8], strides = [1, 1]} : vector<16x32xf32> to vector<8x8xf32>
    %248 = vector.extract_strided_slice %228 {offsets = [0, 8], sizes = [8, 8], strides = [1, 1]} : vector<16x32xf32> to vector<8x8xf32>
    %249 = vector.extract_strided_slice %228 {offsets = [0, 16], sizes = [8, 8], strides = [1, 1]} : vector<16x32xf32> to vector<8x8xf32>
    %250 = vector.extract_strided_slice %228 {offsets = [0, 24], sizes = [8, 8], strides = [1, 1]} : vector<16x32xf32> to vector<8x8xf32>
    %251 = vector.extract_strided_slice %228 {offsets = [8, 0], sizes = [8, 8], strides = [1, 1]} : vector<16x32xf32> to vector<8x8xf32>
    %252 = vector.extract_strided_slice %228 {offsets = [8, 8], sizes = [8, 8], strides = [1, 1]} : vector<16x32xf32> to vector<8x8xf32>
    %253 = vector.extract_strided_slice %228 {offsets = [8, 16], sizes = [8, 8], strides = [1, 1]} : vector<16x32xf32> to vector<8x8xf32>
    %254 = vector.extract_strided_slice %228 {offsets = [8, 24], sizes = [8, 8], strides = [1, 1]} : vector<16x32xf32> to vector<8x8xf32>
    %255 = vector.shape_cast %247 : vector<8x8xf32> to vector<1x8x8xf32>
    %256 = vector.shape_cast %248 : vector<8x8xf32> to vector<1x8x8xf32>
    %257 = vector.shape_cast %249 : vector<8x8xf32> to vector<1x8x8xf32>
    %258 = vector.shape_cast %250 : vector<8x8xf32> to vector<1x8x8xf32>
    %259 = vector.shape_cast %251 : vector<8x8xf32> to vector<1x8x8xf32>
    %260 = vector.shape_cast %252 : vector<8x8xf32> to vector<1x8x8xf32>
    %261 = vector.shape_cast %253 : vector<8x8xf32> to vector<1x8x8xf32>
    %262 = vector.shape_cast %254 : vector<8x8xf32> to vector<1x8x8xf32>
    %263 = tpu.concatenate %255, %256, %257, %258, %259, %260, %261, %262 in 0 : vector<1x8x8xf32>, vector<1x8x8xf32>, vector<1x8x8xf32>, vector<1x8x8xf32>, vector<1x8x8xf32>, vector<1x8x8xf32>, vector<1x8x8xf32>, vector<1x8x8xf32> -> vector<8x8x8xf32>
    %264 = vector.extract_strided_slice %229 {offsets = [0, 0], sizes = [8, 8], strides = [1, 1]} : vector<16x32xf32> to vector<8x8xf32>
    %265 = vector.extract_strided_slice %229 {offsets = [0, 8], sizes = [8, 8], strides = [1, 1]} : vector<16x32xf32> to vector<8x8xf32>
    %266 = vector.extract_strided_slice %229 {offsets = [0, 16], sizes = [8, 8], strides = [1, 1]} : vector<16x32xf32> to vector<8x8xf32>
    %267 = vector.extract_strided_slice %229 {offsets = [0, 24], sizes = [8, 8], strides = [1, 1]} : vector<16x32xf32> to vector<8x8xf32>
    %268 = vector.extract_strided_slice %229 {offsets = [8, 0], sizes = [8, 8], strides = [1, 1]} : vector<16x32xf32> to vector<8x8xf32>
    %269 = vector.extract_strided_slice %229 {offsets = [8, 8], sizes = [8, 8], strides = [1, 1]} : vector<16x32xf32> to vector<8x8xf32>
    %270 = vector.extract_strided_slice %229 {offsets = [8, 16], sizes = [8, 8], strides = [1, 1]} : vector<16x32xf32> to vector<8x8xf32>
    %271 = vector.extract_strided_slice %229 {offsets = [8, 24], sizes = [8, 8], strides = [1, 1]} : vector<16x32xf32> to vector<8x8xf32>
    %272 = vector.shape_cast %264 : vector<8x8xf32> to vector<1x8x8xf32>
    %273 = vector.shape_cast %265 : vector<8x8xf32> to vector<1x8x8xf32>
    %274 = vector.shape_cast %266 : vector<8x8xf32> to vector<1x8x8xf32>
    %275 = vector.shape_cast %267 : vector<8x8xf32> to vector<1x8x8xf32>
    %276 = vector.shape_cast %268 : vector<8x8xf32> to vector<1x8x8xf32>
    %277 = vector.shape_cast %269 : vector<8x8xf32> to vector<1x8x8xf32>
    %278 = vector.shape_cast %270 : vector<8x8xf32> to vector<1x8x8xf32>
    %279 = vector.shape_cast %271 : vector<8x8xf32> to vector<1x8x8xf32>
    %280 = tpu.concatenate %272, %273, %274, %275, %276, %277, %278, %279 in 0 : vector<1x8x8xf32>, vector<1x8x8xf32>, vector<1x8x8xf32>, vector<1x8x8xf32>, vector<1x8x8xf32>, vector<1x8x8xf32>, vector<1x8x8xf32>, vector<1x8x8xf32> -> vector<8x8x8xf32>
    "tpu.trace_start"() <{level = 10 : i32, message = "gqd,gkd->gqk"}> : () -> ()
    %cst_123 = arith.constant dense<0.000000e+00> : vector<8x8x8xf32>
    %281 = tpu.matmul %246, %263, %cst_123 {dimension_numbers = #tpu.dot_dimension_numbers<[2], [2], [1], [1], [0, 0, 0, 1, 1, 1], [0], [0]>} : vector<8x8x8xf32>, vector<8x8x8xf32>, vector<8x8x8xf32> -> vector<8x8x8xf32>
    "tpu.trace_stop"() : () -> ()
    %282 = vector.broadcast %218 : vector<8x1x8xf32> to vector<8x8x8xf32>
    %283 = arith.addf %281, %282 : vector<8x8x8xf32>
    %cst_124 = arith.constant dense<0xFF800000> : vector<8x8xf32>
    %284 = vector.multi_reduction <maximumf>, %283, %cst_124 [2] : vector<8x8x8xf32> to vector<8x8xf32>
    %285 = vector.shape_cast %284 : vector<8x8xf32> to vector<8x8x1xf32>
    %286 = vector.broadcast %285 : vector<8x8x1xf32> to vector<8x8x8xf32>
    %287 = arith.subf %283, %286 : vector<8x8x8xf32>
    %288 = math.exp %287 : vector<8x8x8xf32>
    %cst_125 = arith.constant dense<0.000000e+00> : vector<8x8xf32>
    %289 = vector.multi_reduction <add>, %288, %cst_125 [2] : vector<8x8x8xf32> to vector<8x8xf32>
    %290 = vector.shape_cast %289 : vector<8x8xf32> to vector<8x8x1xf32>
    %291 = tpu.reciprocal %290 {approx = true} : vector<8x8x1xf32> -> vector<8x8x1xf32>
    %292 = vector.broadcast %291 : vector<8x8x1xf32> to vector<8x8x8xf32>
    %293 = arith.mulf %288, %292 : vector<8x8x8xf32>
    "tpu.trace_start"() <{level = 10 : i32, message = "gqk,gkd->gqd"}> : () -> ()
    %cst_126 = arith.constant dense<0.000000e+00> : vector<8x8x8xf32>
    %294 = tpu.matmul %293, %280, %cst_126 {dimension_numbers = #tpu.dot_dimension_numbers<[2], [1], [1], [2], [0, 0, 0, 1, 1, 2], [0], [0]>} : vector<8x8x8xf32>, vector<8x8x8xf32>, vector<8x8x8xf32> -> vector<8x8x8xf32>
    "tpu.trace_stop"() : () -> ()
    %295 = vector.extract_strided_slice %294 {offsets = [0, 0, 0], sizes = [1, 8, 8], strides = [1, 1, 1]} : vector<8x8x8xf32> to vector<1x8x8xf32>
    %296 = vector.shape_cast %295 : vector<1x8x8xf32> to vector<8x8xf32>
    %297 = vector.extract_strided_slice %294 {offsets = [1, 0, 0], sizes = [1, 8, 8], strides = [1, 1, 1]} : vector<8x8x8xf32> to vector<1x8x8xf32>
    %298 = vector.shape_cast %297 : vector<1x8x8xf32> to vector<8x8xf32>
    %299 = vector.extract_strided_slice %294 {offsets = [2, 0, 0], sizes = [1, 8, 8], strides = [1, 1, 1]} : vector<8x8x8xf32> to vector<1x8x8xf32>
    %300 = vector.shape_cast %299 : vector<1x8x8xf32> to vector<8x8xf32>
    %301 = vector.extract_strided_slice %294 {offsets = [3, 0, 0], sizes = [1, 8, 8], strides = [1, 1, 1]} : vector<8x8x8xf32> to vector<1x8x8xf32>
    %302 = vector.shape_cast %301 : vector<1x8x8xf32> to vector<8x8xf32>
    %303 = tpu.concatenate %296, %298, %300, %302 in 1 : vector<8x8xf32>, vector<8x8xf32>, vector<8x8xf32>, vector<8x8xf32> -> vector<8x32xf32>
    %304 = vector.extract_strided_slice %294 {offsets = [4, 0, 0], sizes = [1, 8, 8], strides = [1, 1, 1]} : vector<8x8x8xf32> to vector<1x8x8xf32>
    %305 = vector.shape_cast %304 : vector<1x8x8xf32> to vector<8x8xf32>
    %306 = vector.extract_strided_slice %294 {offsets = [5, 0, 0], sizes = [1, 8, 8], strides = [1, 1, 1]} : vector<8x8x8xf32> to vector<1x8x8xf32>
    %307 = vector.shape_cast %306 : vector<1x8x8xf32> to vector<8x8xf32>
    %308 = vector.extract_strided_slice %294 {offsets = [6, 0, 0], sizes = [1, 8, 8], strides = [1, 1, 1]} : vector<8x8x8xf32> to vector<1x8x8xf32>
    %309 = vector.shape_cast %308 : vector<1x8x8xf32> to vector<8x8xf32>
    %310 = vector.extract_strided_slice %294 {offsets = [7, 0, 0], sizes = [1, 8, 8], strides = [1, 1, 1]} : vector<8x8x8xf32> to vector<1x8x8xf32>
    %311 = vector.shape_cast %310 : vector<1x8x8xf32> to vector<8x8xf32>
    %312 = tpu.concatenate %305, %307, %309, %311 in 1 : vector<8x8xf32>, vector<8x8xf32>, vector<8x8xf32>, vector<8x8xf32> -> vector<8x32xf32>
    %313 = tpu.concatenate %303, %312 in 0 : vector<8x32xf32>, vector<8x32xf32> -> vector<16x32xf32>
    %314 = arith.truncf %313 : vector<16x32xf32> to vector<16x32xbf16>
    %c0_127 = arith.constant 0 : index
    %c0_128 = arith.constant 0 : index
    %c0_129 = arith.constant 0 : index
    %315 = vector.load %arg3[%c0_127, %c0_128, %c0_129] : memref<2x32x32xbf16, #tpu.memory_space<vmem>>, vector<1x32x32xbf16>
    %316 = vector.shape_cast %315 : vector<1x32x32xbf16> to vector<32x32xbf16>
    %cst_130 = arith.constant dense<0.000000e+00> : vector<16x32xf32>
    %317 = tpu.matmul %314, %316, %cst_130 {dimension_numbers = #tpu.dot_dimension_numbers<[1], [0], [0], [1], [0, 0, 1, 1], [], []>} : vector<16x32xbf16>, vector<32x32xbf16>, vector<16x32xf32> -> vector<16x32xf32>
    %c3_131 = arith.constant 3 : index
    %c0_132 = arith.constant 0 : index
    %318 = vector.load %arg7[%c3_131, %c0_132] : memref<12x128xf32, #tpu.memory_space<vmem>>, vector<1x32xf32>
    %319 = vector.broadcast %318 : vector<1x32xf32> to vector<16x32xf32>
    %320 = arith.addf %317, %319 : vector<16x32xf32>
    %321 = arith.addf %200, %320 : vector<16x32xf32>
    %c4_133 = arith.constant 4 : index
    %c0_134 = arith.constant 0 : index
    %322 = vector.load %arg7[%c4_133, %c0_134] : memref<12x128xf32, #tpu.memory_space<vmem>>, vector<1x32xf32>
    %c5_135 = arith.constant 5 : index
    %c0_136 = arith.constant 0 : index
    %323 = vector.load %arg7[%c5_135, %c0_136] : memref<12x128xf32, #tpu.memory_space<vmem>>, vector<1x32xf32>
    %cst_137 = arith.constant dense<0.000000e+00> : vector<16xf32>
    %324 = vector.multi_reduction <add>, %321, %cst_137 [1] : vector<16x32xf32> to vector<16xf32>
    %325 = vector.shape_cast %324 : vector<16xf32> to vector<16x1xf32>
    %cst_138 = arith.constant 3.200000e+01 : f32
    %326 = vector.broadcast %cst_138 : f32 to vector<16x1xf32>
    %327 = arith.divf %325, %326 : vector<16x1xf32>
    %328 = vector.broadcast %327 : vector<16x1xf32> to vector<16x32xf32>
    %329 = arith.subf %321, %328 : vector<16x32xf32>
    %330 = arith.mulf %329, %329 : vector<16x32xf32>
    %cst_139 = arith.constant dense<0.000000e+00> : vector<16xf32>
    %331 = vector.multi_reduction <add>, %330, %cst_139 [1] : vector<16x32xf32> to vector<16xf32>
    %332 = vector.shape_cast %331 : vector<16xf32> to vector<16x1xf32>
    %cst_140 = arith.constant 3.200000e+01 : f32
    %333 = vector.broadcast %cst_140 : f32 to vector<16x1xf32>
    %334 = arith.divf %332, %333 : vector<16x1xf32>
    %335 = vector.broadcast %327 : vector<16x1xf32> to vector<16x32xf32>
    %336 = arith.subf %321, %335 : vector<16x32xf32>
    %cst_141 = arith.constant 9.99999996E-13 : f32
    %337 = vector.broadcast %cst_141 : f32 to vector<16x1xf32>
    %338 = arith.addf %334, %337 : vector<16x1xf32>
    %339 = math.rsqrt %338 : vector<16x1xf32>
    %340 = vector.broadcast %339 : vector<16x1xf32> to vector<16x32xf32>
    %341 = arith.mulf %336, %340 : vector<16x32xf32>
    %342 = vector.broadcast %322 : vector<1x32xf32> to vector<16x32xf32>
    %343 = arith.mulf %341, %342 : vector<16x32xf32>
    %344 = vector.broadcast %323 : vector<1x32xf32> to vector<16x32xf32>
    %345 = arith.addf %343, %344 : vector<16x32xf32>
    %346 = arith.truncf %345 : vector<16x32xf32> to vector<16x32xbf16>
    %c0_142 = arith.constant 0 : index
    %c0_143 = arith.constant 0 : index
    %347 = vector.load %arg4[%c0_142, %c0_143] : memref<32x64xbf16, #tpu.memory_space<vmem>>, vector<32x64xbf16>
    %cst_144 = arith.constant dense<0.000000e+00> : vector<16x64xf32>
    %348 = tpu.matmul %346, %347, %cst_144 {dimension_numbers = #tpu.dot_dimension_numbers<[1], [0], [0], [1], [0, 0, 1, 1], [], []>} : vector<16x32xbf16>, vector<32x64xbf16>, vector<16x64xf32> -> vector<16x64xf32>
    %c6_145 = arith.constant 6 : index
    %c0_146 = arith.constant 0 : index
    %349 = vector.load %arg7[%c6_145, %c0_146] : memref<12x128xf32, #tpu.memory_space<vmem>>, vector<1x64xf32>
    %350 = vector.broadcast %349 : vector<1x64xf32> to vector<16x64xf32>
    %351 = arith.addf %348, %350 : vector<16x64xf32>
    %352 = arith.mulf %351, %351 : vector<16x64xf32>
    %353 = arith.mulf %351, %352 : vector<16x64xf32>
    %cst_147 = arith.constant 4.471500e-02 : f32
    %354 = vector.broadcast %cst_147 : f32 to vector<16x64xf32>
    %355 = arith.mulf %354, %353 : vector<16x64xf32>
    %356 = arith.addf %351, %355 : vector<16x64xf32>
    %cst_148 = arith.constant 0.797884583 : f32
    %357 = vector.broadcast %cst_148 : f32 to vector<16x64xf32>
    %358 = arith.mulf %357, %356 : vector<16x64xf32>
    %359 = math.tanh %358 : vector<16x64xf32>
    %cst_149 = arith.constant 1.000000e+00 : f32
    %360 = vector.broadcast %cst_149 : f32 to vector<16x64xf32>
    %361 = arith.addf %360, %359 : vector<16x64xf32>
    %cst_150 = arith.constant 5.000000e-01 : f32
    %362 = vector.broadcast %cst_150 : f32 to vector<16x64xf32>
    %363 = arith.mulf %362, %361 : vector<16x64xf32>
    %364 = arith.mulf %351, %363 : vector<16x64xf32>
    %365 = arith.truncf %364 : vector<16x64xf32> to vector<16x64xbf16>
    %c0_151 = arith.constant 0 : index
    %c0_152 = arith.constant 0 : index
    %366 = vector.load %arg5[%c0_151, %c0_152] : memref<64x32xbf16, #tpu.memory_space<vmem>>, vector<64x32xbf16>
    %cst_153 = arith.constant dense<0.000000e+00> : vector<16x32xf32>
    %367 = tpu.matmul %365, %366, %cst_153 {dimension_numbers = #tpu.dot_dimension_numbers<[1], [0], [0], [1], [0, 0, 1, 1], [], []>} : vector<16x64xbf16>, vector<64x32xbf16>, vector<16x32xf32> -> vector<16x32xf32>
    %c7_154 = arith.constant 7 : index
    %c0_155 = arith.constant 0 : index
    %368 = vector.load %arg7[%c7_154, %c0_155] : memref<12x128xf32, #tpu.memory_space<vmem>>, vector<1x32xf32>
    %369 = vector.broadcast %368 : vector<1x32xf32> to vector<16x32xf32>
    %370 = arith.addf %367, %369 : vector<16x32xf32>
    %371 = arith.addf %345, %370 : vector<16x32xf32>
    %c8_156 = arith.constant 8 : index
    %c0_157 = arith.constant 0 : index
    %372 = vector.load %arg7[%c8_156, %c0_157] : memref<12x128xf32, #tpu.memory_space<vmem>>, vector<1x32xf32>
    %c9_158 = arith.constant 9 : index
    %c0_159 = arith.constant 0 : index
    %373 = vector.load %arg7[%c9_158, %c0_159] : memref<12x128xf32, #tpu.memory_space<vmem>>, vector<1x32xf32>
    %cst_160 = arith.constant dense<0.000000e+00> : vector<16xf32>
    %374 = vector.multi_reduction <add>, %371, %cst_160 [1] : vector<16x32xf32> to vector<16xf32>
    %375 = vector.shape_cast %374 : vector<16xf32> to vector<16x1xf32>
    %cst_161 = arith.constant 3.200000e+01 : f32
    %376 = vector.broadcast %cst_161 : f32 to vector<16x1xf32>
    %377 = arith.divf %375, %376 : vector<16x1xf32>
    %378 = vector.broadcast %377 : vector<16x1xf32> to vector<16x32xf32>
    %379 = arith.subf %371, %378 : vector<16x32xf32>
    %380 = arith.mulf %379, %379 : vector<16x32xf32>
    %cst_162 = arith.constant dense<0.000000e+00> : vector<16xf32>
    %381 = vector.multi_reduction <add>, %380, %cst_162 [1] : vector<16x32xf32> to vector<16xf32>
    %382 = vector.shape_cast %381 : vector<16xf32> to vector<16x1xf32>
    %cst_163 = arith.constant 3.200000e+01 : f32
    %383 = vector.broadcast %cst_163 : f32 to vector<16x1xf32>
    %384 = arith.divf %382, %383 : vector<16x1xf32>
    %385 = vector.broadcast %377 : vector<16x1xf32> to vector<16x32xf32>
    %386 = arith.subf %371, %385 : vector<16x32xf32>
    %cst_164 = arith.constant 9.99999996E-13 : f32
    %387 = vector.broadcast %cst_164 : f32 to vector<16x1xf32>
    %388 = arith.addf %384, %387 : vector<16x1xf32>
    %389 = math.rsqrt %388 : vector<16x1xf32>
    %390 = vector.broadcast %389 : vector<16x1xf32> to vector<16x32xf32>
    %391 = arith.mulf %386, %390 : vector<16x32xf32>
    %392 = vector.broadcast %372 : vector<1x32xf32> to vector<16x32xf32>
    %393 = arith.mulf %391, %392 : vector<16x32xf32>
    %394 = vector.broadcast %373 : vector<1x32xf32> to vector<16x32xf32>
    %395 = arith.addf %393, %394 : vector<16x32xf32>
    %396 = vector.extract_strided_slice %395 {offsets = [0, 0], sizes = [1, 32], strides = [1, 1]} : vector<16x32xf32> to vector<1x32xf32>
    %397 = vector.extract_strided_slice %395 {offsets = [8, 0], sizes = [1, 32], strides = [1, 1]} : vector<16x32xf32> to vector<1x32xf32>
    %398 = tpu.concatenate %396, %397 in 0 : vector<1x32xf32>, vector<1x32xf32> -> vector<2x32xf32>
    %399 = arith.truncf %398 : vector<2x32xf32> to vector<2x32xbf16>
    %c1_165 = arith.constant 1 : index
    %c0_166 = arith.constant 0 : index
    %c0_167 = arith.constant 0 : index
    %400 = vector.load %arg3[%c1_165, %c0_166, %c0_167] : memref<2x32x32xbf16, #tpu.memory_space<vmem>>, vector<1x32x32xbf16>
    %401 = vector.shape_cast %400 : vector<1x32x32xbf16> to vector<32x32xbf16>
    %cst_168 = arith.constant dense<0.000000e+00> : vector<2x32xf32>
    %402 = tpu.matmul %399, %401, %cst_168 {dimension_numbers = #tpu.dot_dimension_numbers<[1], [0], [0], [1], [0, 0, 1, 1], [], []>} : vector<2x32xbf16>, vector<32x32xbf16>, vector<2x32xf32> -> vector<2x32xf32>
    %c10_169 = arith.constant 10 : index
    %c0_170 = arith.constant 0 : index
    %403 = vector.load %arg7[%c10_169, %c0_170] : memref<12x128xf32, #tpu.memory_space<vmem>>, vector<1x32xf32>
    %404 = vector.broadcast %403 : vector<1x32xf32> to vector<2x32xf32>
    %405 = arith.addf %402, %404 : vector<2x32xf32>
    %406 = math.tanh %405 : vector<2x32xf32>
    %407 = arith.truncf %406 : vector<2x32xf32> to vector<2x32xbf16>
    %c0_171 = arith.constant 0 : index
    %c0_172 = arith.constant 0 : index
    %408 = vector.load %arg6[%c0_171, %c0_172] : memref<32x128xbf16, #tpu.memory_space<vmem>>, vector<32x128xbf16>
    %cst_173 = arith.constant dense<0.000000e+00> : vector<2x128xf32>
    %409 = tpu.matmul %407, %408, %cst_173 {dimension_numbers = #tpu.dot_dimension_numbers<[1], [0], [0], [1], [0, 0, 1, 1], [], []>} : vector<2x32xbf16>, vector<32x128xbf16>, vector<2x128xf32> -> vector<2x128xf32>
    %c11_174 = arith.constant 11 : index
    %c0_175 = arith.constant 0 : index
    %410 = vector.load %arg7[%c11_174, %c0_175] : memref<12x128xf32, #tpu.memory_space<vmem>>, vector<1x128xf32>
    %411 = vector.broadcast %410 : vector<1x128xf32> to vector<2x128xf32>
    %412 = arith.addf %409, %411 : vector<2x128xf32>
    %c0_176 = arith.constant 0 : index
    %c0_177 = arith.constant 0 : index
    %413 = vector.load %arg8[%c0_176, %c0_177] : memref<2x128xf32, #tpu.memory_space<vmem>>, vector<2x128xf32>
    tpu.vector_store %arg8[%c0_176, %c0_177], %412 {strides = array<i32>} : memref<2x128xf32, #tpu.memory_space<vmem>>, vector<2x128xf32>,
    return
  }
}

</mosaic_0001>

<bundles_post_ra>
// kernel: bert_classifier_forward.1
= control target key start
LH: loop header
LB: loop body
LE: loop exit
PB: predicated region body
PF: predicated region fallthrough
CT: control target
= control target key end

     0   :  { %s3248_s0 = inlined_call_operand.vmem [shape: s32[34], index: 0, kind: input, shape index: {}]   ;;  %s3249_s1 = inlined_call_operand.vmem [shape: f32[110,32], index: 1, kind: input, shape index: {}]   ;;  %s3250_s2 = inlined_call_operand.vmem [shape: bf16[32,96], index: 2, kind: input, shape index: {}]   ;;  %s3251_s3 = inlined_call_operand.vmem [shape: bf16[2,32,32], index: 3, kind: input, shape index: {}]   ;;  %s3252_s4 = inlined_call_operand.vmem [shape: bf16[32,64], index: 4, kind: input, shape index: {}]   ;;  %s3253_s5 = inlined_call_operand.vmem [shape: bf16[64,32], index: 5, kind: input, shape index: {}]   ;;  %s3254_s6 = inlined_call_operand.vmem [shape: bf16[32,128], index: 6, kind: input, shape index: {}]   ;;  %s3255_s7 = inlined_call_operand.vmem [shape: f32[12,128], index: 7, kind: input, shape index: {}]   ;;  %s3256_s8 = inlined_call_operand.hbm [shape: f32[2,128], index: 8, kind: output, shape index: {}]  }
   0x1   :  { %3258 = sst [smem:[#allocation9_spill]] %s3256_s8 }
   0x2   :  { %13 = vsyncpa [#allocation5], 0 }
   0x3   :  { %14 = vsyncpa [#allocation4], 0  ;;  %s21_s29 = sshll.u32 %s3248_s0, 4  ;;  %s22_s29 = int_to_ptr.vmem [resolvable:$true] %s21_s29 }
   0x4   :  { %s2646_s30 = scalar_lea.vmem %s22_s29, 16  ;;  %p2651_p1 = scmp.lt.s32.totalorder %s22_s29, %s22_s29 }
   0x5   :  { %p2647_p0 = scmp.ne.s32.totalorder %s22_s29, %s2646_s30  ;;  %p2652_p2 = scmp.lt.s32.totalorder %s2646_s30, %s2646_s30 }
   0x7   :  { %p2653_p3 = por %p2652_p2, %p2651_p1 }
   0x9   :  { %p2654_p4 = pnand %p2653_p3, %p2647_p0 }
   0xb   :  { %2657 = shalt.err (!%p2654_p4)
}
   0xc   :  { %s2684_s9 = smov [#allocation3]  }
   0xd   :  { %24 = dma.vmem_to_smem %s22_s29, 16, %s2684_s9, [#allocation5]  }
   0xe   :  { %2680 = dma.done.wait [#allocation5], 16  }
   0xf   :  { %2681 = vsyncadd [#allocation5], 4294967280 }
  0x10   :  { %42 = sfence }
  0x11   :  { %s44_s10 = sld [smem:[#allocation3]]  ;;  %s2262_s12 = sld [smem:[#allocation3 + $0x1]]  ;;  %v48_v0 = vld [vmem:[%s3249_s1 + $0x64] sm:$0x1]  ;;  %vm54_vm0 = vcmask 253952   ;;  %vm225_vm1 = vcmask 261120  }
  0x12   :  { %s2260_s11 = sld [smem:[#allocation3 + $0x10]]  ;;  %s2263_s13 = sld [smem:[#allocation3 + $0x11]]  ;;  %v60_v1 = vld [vmem:[%s3249_s1 + $0x65] sm:$0x1]  ;;  %v71_v4 = vld [vmem:[%s3249_s1 + $0x66] sm:$0x1] }
  0x13   :  { %s2265_s14 = sld [smem:[#allocation3 + $0x2]]  ;;  %s2746_s0 = sld [smem:[#allocation3 + $0x3]]  ;;  %v82_v8 = vld [vmem:[%s3249_s1 + $0x67] sm:$0x1]  ;;  %v93_v12 = vld [vmem:[%s3249_s1 + $0x68] sm:$0x1] }
  0x14   :  { %s2266_s15 = sld [smem:[#allocation3 + $0x12]]  ;;  %s2748_s16 = sld [smem:[#allocation3 + $0x13]]  ;;  %v104_v17 = vld [vmem:[%s3249_s1 + $0x69] sm:$0x1]  ;;  %v115_v30 = vld [vmem:[%s3249_s1 + $0x6a] sm:$0x1] }
  0x15   :  { %s2750_s17 = sld [smem:[#allocation3 + $0x4]]  ;;  %s2757_s21 = sld [smem:[#allocation3 + $0x5]]  ;;  %v126_v31 = vld [vmem:[%s3249_s1 + $0x6b] sm:$0x1]  ;;  %v137_v32 = vld [vmem:[%s3249_s1 + $0x64] sm:$0x1] }
  0x16   :  { %s2752_s18 = sld [smem:[#allocation3 + $0x14]]  ;;  %s2759_s22 = sld [smem:[#allocation3 + $0x15]]  ;;  %v148_v33 = vld [vmem:[%s3249_s1 + $0x65] sm:$0x1]  ;;  %v159_v35 = vld [vmem:[%s3249_s1 + $0x66] sm:$0x1] }
  0x17   :  { %s46_s25 = scalar_lea.vmem %s3249_s1, %s44_s10  ;;  %s58_s20 = scalar_lea.vmem %s3249_s1, %s2262_s12  ;;  %v170_v39 = vld [vmem:[%s3249_s1 + $0x67] sm:$0x1]  ;;  %v181_v60 = vld [vmem:[%s3249_s1 + $0x68] sm:$0x1]  ;;  %v192_v61 = vld [vmem:[%s3249_s1 + $0x69] sm:$0x1] }
  0x18   :  { %s2213_s28 = scalar_lea.vmem %s3249_s1, %s2260_s11  ;;  %v47_v2 = vld [vmem:[%s46_s25] sm:$0x1]  ;;  %s2216_s10 = scalar_lea.vmem %s3249_s1, %s2263_s13  ;;  %v203_v62 = vld [vmem:[%s3249_s1 + $0x6a] sm:$0x1]  ;;  %v214_v63 = vld [vmem:[%s3249_s1 + $0x6b] sm:$0x1] }
  0x19   :  { %v2261_v3 = vld [vmem:[%s2213_s28 + $0x6c] sm:$0x1]  ;;  %v49_v5 = vadd.f32 %v48_v0, %v47_v2  ;;  %v59_v6 = vld [vmem:[%s58_s20] sm:$0x1]  ;;  %s69_s27 = scalar_lea.vmem %s3249_s1, %s2265_s14  ;;  %s80_s19 = scalar_lea.vmem %s3249_s1, %s2746_s0  ;;  %vm2686_vm2 = vmmov 0   ;;  %vm408_vm3 = vcmask 64512  }
  0x1a   :  { %v2264_v7 = vld [vmem:[%s2216_s10 + $0x6c] sm:$0x1]  ;;  %s2219_s12 = scalar_lea.vmem %s3249_s1, %s2266_s15  ;;  %v61_v9 = vadd.f32 %v60_v1, %v59_v6  ;;  %v70_v10 = vld [vmem:[%s69_s27] sm:$0x1]  ;;  %s2222_s14 = scalar_lea.vmem %s3249_s1, %s2748_s16  ;;  %vm275_vm6 = vcmask 1040384   ;;  %vm1724_vm7 = vcmask 130048  }
  0x1b   :  { %v2267_v11 = vld [vmem:[%s2219_s12 + $0x6c] sm:$0x1]  ;;  %v53_v13 = vadd.f32 %v2261_v3, %v49_v5  ;;  %v72_v14 = vadd.f32 %v71_v4, %v70_v10  ;;  %v81_v15 = vld [vmem:[%s80_s19] sm:$0x1]  ;;  %s91_s11 = scalar_lea.vmem %s3249_s1, %s2750_s17  ;;  %s102_s30 = scalar_lea.vmem %s3249_s1, %s2757_s21  ;;  %vm1726_vm8 = vcmask 195584   ;;  %vm1973_vm9 = vcmask 523264  }
  0x1c   :  { %v2270_v16 = vld [vmem:[%s2222_s14 + $0x6c] sm:$0x1]  ;;  %s2225_s0 = scalar_lea.vmem %s3249_s1, %s2752_s18  ;;  %v65_v18 = vadd.f32 %v2264_v7, %v61_v9  ;;  %v83_v19 = vadd.f32 %v82_v8, %v81_v15  ;;  %v92_v20 = vld [vmem:[%s91_s11] sm:$0x1]  ;;  %s2228_s17 = scalar_lea.vmem %s3249_s1, %s2759_s22 }
  0x1d   :  { %v2273_v21 = vld [vmem:[%s2225_s0 + $0x6c] sm:$0x1]  ;;  %55 = vst.msk [vmem:[#allocation2] sm:$0x1] %vm54_vm0, %v53_v13  ;;  %v76_v22 = vadd.f32 %v2267_v11, %v72_v14  ;;  %v94_v23 = vadd.f32 %v93_v12, %v92_v20  ;;  %v103_v24 = vld [vmem:[%s102_s30] sm:$0x1] }
  0x1e   :  { %v2276_v25 = vld [vmem:[%s2228_s17 + $0x6c] sm:$0x1]  ;;  %s2277_s18 = sld [smem:[#allocation3 + $0x6]]  ;;  %66 = vst.msk [vmem:[#allocation2 + $0x1] sm:$0x1] %vm54_vm0, %v65_v18  ;;  %v87_v26 = vadd.f32 %v2270_v16, %v83_v19  ;;  %v105_v27 = vadd.f32 %v104_v17, %v103_v24  ;;  %s2280_s19 = sld [smem:[#allocation3 + $0x7]] }
  0x1f   :  { %s2278_s9 = sld [smem:[#allocation3 + $0x16]]  ;;  %77 = vst.msk [vmem:[#allocation2 + $0x2] sm:$0x1] %vm54_vm0, %v76_v22  ;;  %v98_v28 = vadd.f32 %v2273_v21, %v94_v23  ;;  %s2821_s21 = sld [smem:[#allocation3 + $0x17]] }
  0x20   :  { %s2823_s20 = sld [smem:[#allocation3 + $0x8]]  ;;  %88 = vst.msk [vmem:[#allocation2 + $0x3] sm:$0x1] %vm54_vm0, %v87_v26  ;;  %v109_v29 = vadd.f32 %v2276_v25, %v105_v27  ;;  %s2831_s10 = sld [smem:[#allocation3 + $0x9]] }
  0x21   :  { %s2829_s14 = sld [smem:[#allocation3 + $0x18]]  ;;  %99 = vst.msk [vmem:[#allocation2 + $0x4] sm:$0x1] %vm54_vm0, %v98_v28  ;;  %s2837_s26 = sld [smem:[#allocation3 + $0x19]] }
  0x22   :  { %s2839_s11 = sld [smem:[#allocation3 + $0xa]]  ;;  %110 = vst.msk [vmem:[#allocation2 + $0x5] sm:$0x1] %vm54_vm0, %v109_v29  ;;  %s2847_s28 = sld [smem:[#allocation3 + $0xb]] }
  0x23   :  { %s2845_s0 = sld [smem:[#allocation3 + $0x1a]]  ;;  %s2855_s13 = sld [smem:[#allocation3 + $0x1b]] }
  0x24   :  { %s113_s12 = scalar_lea.vmem %s3249_s1, %s2277_s18  ;;  %s124_s25 = scalar_lea.vmem %s3249_s1, %s2280_s19 }
  0x25   :  { %v114_v34 = vld [vmem:[%s113_s12] sm:$0x1]  ;;  %s2231_s23 = scalar_lea.vmem %s3249_s1, %s2278_s9  ;;  %s2234_s12 = scalar_lea.vmem %s3249_s1, %s2821_s21 }
  0x26   :  { %v116_v36 = vadd.f32 %v115_v30, %v114_v34  ;;  %v2279_v37 = vld [vmem:[%s2231_s23 + $0x6c] sm:$0x1]  ;;  %v125_v38 = vld [vmem:[%s124_s25] sm:$0x1]  ;;  %s135_s9 = scalar_lea.vmem %s3249_s1, %s2823_s20  ;;  %s146_s21 = scalar_lea.vmem %s3249_s1, %s2831_s10 }
  0x27   :  { %v127_v40 = vadd.f32 %v126_v31, %v125_v38  ;;  %v2282_v41 = vld [vmem:[%s2234_s12 + $0x6c] sm:$0x1]  ;;  %v136_v42 = vld [vmem:[%s135_s9] sm:$0x1]  ;;  %s2237_s24 = scalar_lea.vmem %s3249_s1, %s2829_s14  ;;  %s2240_s29 = scalar_lea.vmem %s3249_s1, %s2837_s26  ;;  %v2685_v31 = vmov 0.0  }
  0x28   :  { %v120_v43 = vadd.f32 %v2279_v37, %v116_v36  ;;  %v138_v44 = vadd.f32 %v137_v32, %v136_v42  ;;  %v2285_v45 = vld [vmem:[%s2237_s24 + $0x6c] sm:$0x1]  ;;  %v147_v46 = vld [vmem:[%s146_s21] sm:$0x1]  ;;  %s157_s12 = scalar_lea.vmem %s3249_s1, %s2839_s11  ;;  %s168_s17 = scalar_lea.vmem %s3249_s1, %s2847_s28  ;;  %2421 = vmatprep.subr.bf16.mxu0 %v2685_v31  ;;  %2429 = vmatprep.subr.mxu1 %v2685_v31 }
  0x29   :  { %v131_v47 = vadd.f32 %v2282_v41, %v127_v40  ;;  %v149_v48 = vadd.f32 %v148_v33, %v147_v46  ;;  %v2288_v49 = vld [vmem:[%s2240_s29 + $0x6c] sm:$0x1]  ;;  %v158_v50 = vld [vmem:[%s157_s12] sm:$0x1]  ;;  %s2243_s30 = scalar_lea.vmem %s3249_s1, %s2845_s0  ;;  %s2246_s22 = scalar_lea.vmem %s3249_s1, %s2855_s13  ;;  %2425 = vmatprep.mubr.msk.bf16.mxu0 %vm2686_vm2, %v2685_v31  ;;  %2431 = vmatprep.mubr.msk.f32.mxu1 %vm2686_vm2, %v2685_v31 }
  0x2a   :  { %121 = vst.msk [vmem:[#allocation2 + $0x6] sm:$0x1] %vm54_vm0, %v120_v43  ;;  %v142_v51 = vadd.f32 %v2285_v45, %v138_v44  ;;  %v160_v52 = vadd.f32 %v159_v35, %v158_v50  ;;  %v2291_v53 = vld [vmem:[%s2243_s30 + $0x6c] sm:$0x1]  ;;  %v169_v54 = vld [vmem:[%s168_s17] sm:$0x1] }
  0x2b   :  { %s2295_s19 = sld [smem:[#allocation3 + $0xc]]  ;;  %132 = vst.msk [vmem:[#allocation2 + $0x7] sm:$0x1] %vm54_vm0, %v131_v47  ;;  %v153_v55 = vadd.f32 %v2288_v49, %v149_v48  ;;  %v171_v56 = vadd.f32 %v170_v39, %v169_v54  ;;  %v2294_v57 = vld [vmem:[%s2246_s22 + $0x6c] sm:$0x1]  ;;  %s2298_s23 = sld [smem:[#allocation3 + $0xd]] }
  0x2c   :  { %s2296_s0 = sld [smem:[#allocation3 + $0x1c]]  ;;  %143 = vst.msk [vmem:[#allocation2 + $0x8] sm:$0x1] %vm54_vm0, %v142_v51  ;;  %v164_v58 = vadd.f32 %v2291_v53, %v160_v52  ;;  %s2299_s28 = sld [smem:[#allocation3 + $0x1d]]  ;;  %v2582_v30 = vld [vmem:[%s3250_s2] sm:$0xff]   ;;  %v2583_v32 = vld [vmem:[%s3250_s2 + $0x8] sm:$0xff]  }
  0x2d   :  { %s2301_s24 = sld [smem:[#allocation3 + $0xe]]  ;;  %154 = vst.msk [vmem:[#allocation2 + $0x9] sm:$0x1] %vm54_vm0, %v153_v55  ;;  %v175_v59 = vadd.f32 %v2294_v57, %v171_v56  ;;  %s2304_s21 = sld [smem:[#allocation3 + $0xf]]  ;;  %2422 = vmatpush3.bf16.msra.mxu0 %v2582_v30  ;;  %v2307_v41 = vld [vmem:[%s3255_s7] ss:$0 sm:$0xff] }
  0x2e   :  { %s2302_s13 = sld [smem:[#allocation3 + $0x1e]]  ;;  %165 = vst.msk [vmem:[#allocation2 + $0xa] sm:$0x1] %vm54_vm0, %v164_v58  ;;  %s2305_s29 = sld [smem:[#allocation3 + $0x1f]]  ;;  %2423 = vmatprep.subr.bf16.mxu0 %v2685_v31  ;;  %v2308_v45 = vld [vmem:[%s3255_s7 + $0x1] ss:$0 sm:$0xff] }
  0x2f   :  { %176 = vst.msk [vmem:[#allocation2 + $0xb] sm:$0x1] %vm54_vm0, %v175_v59  ;;  %v2311_v50 = vld [vmem:[%s3255_s7 + $0x2] ss:$0 sm:$0xff]  ;;  %s2688_s25 = smov 120   ;;  %s2689_s20 = smov 104  }
  0x30   :  { %s2309_s27 = sld [smem:[#allocation3 + $0x20]]  ;;  %s2310_s18 = sld [smem:[#allocation3 + $0x21]] }
  0x31   :  { %s179_s10 = scalar_lea.vmem %s3249_s1, %s2295_s19  ;;  %s190_s15 = scalar_lea.vmem %s3249_s1, %s2298_s23  ;;  %2424 = vmatpush3.bf16.msra.mxu0 %v2583_v32 }
  0x32   :  { %v180_v0 = vld [vmem:[%s179_s10] sm:$0x1]  ;;  %s2249_s26 = scalar_lea.vmem %s3249_s1, %s2296_s0  ;;  %s2252_s19 = scalar_lea.vmem %s3249_s1, %s2299_s28  ;;  %2444 = vmatprep.subr.mxu0 %v2685_v31 }
  0x33   :  { %v221_v1 = vld [vmem:[#allocation2] sm:$0xff]  ;;  %v182_v2 = vadd.f32 %v181_v60, %v180_v0  ;;  %v2297_v3 = vld [vmem:[%s2249_s26 + $0x6c] sm:$0x1]  ;;  %s201_s16 = scalar_lea.vmem %s3249_s1, %s2301_s24  ;;  %s212_s30 = scalar_lea.vmem %s3249_s1, %s2304_s21 }
  0x34   :  { %v191_v4 = vld [vmem:[%s190_s15] sm:$0x1]  ;;  %v226_v5 = vsel %vm225_vm1, %v221_v1, 0.0  ;;  %v2300_v7 = vld [vmem:[%s2252_s19 + $0x6c] sm:$0x1]  ;;  %s2255_s23 = scalar_lea.vmem %s3249_s1, %s2302_s13  ;;  %s2258_s8 = scalar_lea.vmem %s3249_s1, %s2305_s29 }
  0x35   :  { %v193_v6 = vadd.f32 %v192_v61, %v191_v4  ;;  %v202_v8 = vld [vmem:[%s201_s16] sm:$0x1]  ;;  %227 = vadd.xlane.f32.xlu0 %v226_v5  ;;  %v186_v9 = vadd.f32 %v2297_v3, %v182_v2  ;;  %v2303_v11 = vld [vmem:[%s2255_s23 + $0x6c] sm:$0x1]  ;;  %s2687_s15 = smov 112   ;;  %s2690_s19 = smov 96  }
  0x36   :  { %v204_v10 = vadd.f32 %v203_v62, %v202_v8  ;;  %v213_v12 = vld [vmem:[%s212_s30] sm:$0x1]  ;;  %v2306_v15 = vld [vmem:[%s2258_s8 + $0x6c] sm:$0x1]  ;;  %s2693_s16 = smov 64   ;;  %s2694_s10 = smov 8  }
  0x37   :  { %v197_v13 = vadd.f32 %v2300_v7, %v193_v6  ;;  %v215_v14 = vadd.f32 %v214_v63, %v213_v12  ;;  %187 = vst.msk [vmem:[#allocation2 + $0xc] sm:$0x1] %vm54_vm0, %v186_v9  ;;  %s2695_s30 = smov 24   ;;  %s2696_s28 = smov 16  }
  0x38   :  { %v208_v16 = vadd.f32 %v2303_v11, %v204_v10 }
  0x39   :  { %198 = vst.msk [vmem:[#allocation2 + $0xd] sm:$0x1] %vm54_vm0, %v197_v13  ;;  %v219_v17 = vadd.f32 %v2306_v15, %v215_v14  ;;  %v265_v15 = vlaneseq }
  0x3a   :  { %209 = vst.msk [vmem:[#allocation2 + $0xe] sm:$0x1] %vm54_vm0, %v208_v16 }
  0x3b   :  { %220 = vst.msk [vmem:[#allocation2 + $0xf] sm:$0x1] %vm54_vm0, %v219_v17  ;;  %v266_v16 = vand.u32 127, %v265_v15  ;;  %v268_v17 = vstv %s2309_s27 }
  0x3d   :  { %vm269_vm4 = vcmp.lt.s32.totalorder %v266_v16, %v268_v17 }
  0x42   :  { %v222_v18 = vld [vmem:[#allocation2 + $0x8] sm:$0xff] }
  0x43   :  { %v229_v19 = vsel %vm225_vm1, %v222_v18, 0.0 }
  0x44   :  { %230 = vadd.xlane.f32.xlu0 %v229_v19  ;;  %v2691_v19 = vmov 1966171168  }
  0xc2   :  { %v228_v20 = vpop.xlane.xlu0 %227 }
  0xc3   :  { %v233_v21 = vmul.f32 0.03125, %v228_v20  ;;  %v279_v20 = vunpack.c.l.s4 %v2691_v19 }
  0xc5   :  { %v235_v22 = vsub.f32 %v221_v1, %v233_v21  ;;  %v280_v21 = vunpack.c.0.s8 %v279_v20 }
  0xc7   :  { %v237_v23 = vmul.f32 %v235_v22, %v235_v22 }
  0xc9   :  { %v239_v24 = vsel %vm225_vm1, %v237_v23, 0.0  ;;  %v2692_v23 = vmov -1e+09  }
  0xca   :  { %240 = vadd.xlane.f32.xlu1 %v239_v24  ;;  %v270_v24 = vsel %vm269_vm4, 0.0, %v2692_v23 }
  0xd1   :  { %v231_v25 = vpop.xlane.xlu0 %230 }
  0xd2   :  { %v234_v26 = vmul.f32 0.03125, %v231_v25 }
  0xd4   :  { %v236_v27 = vsub.f32 %v222_v18, %v234_v26  ;;  %v272_v18 = vstv %s2310_s18 }
  0xd5   :  { %vm273_vm5 = vcmp.lt.s32.totalorder %v266_v16, %v272_v18 }
  0xd6   :  { %v238_v28 = vmul.f32 %v236_v27, %v236_v27  ;;  %v274_v25 = vsel %vm273_vm5, 0.0, %v2692_v23 }
  0xd8   :  { %v242_v29 = vsel %vm225_vm1, %v238_v28, 0.0 }
  0xd9   :  { %243 = vadd.xlane.f32.xlu1 %v242_v29 }
 0x157   :  { %v241_v33 = vpop.xlane.xlu1 %240 }
 0x158   :  { %v245_v34 = vmul.f32 0.03125, %v241_v33 }
 0x15a   :  { %v247_v35 = vadd.f32 1e-12, %v245_v34 }
 0x15c   :  { %2596 = vrsqrt.f32 %v247_v35 }
 0x166   :  { %v244_v36 = vpop.xlane.xlu1 %243  ;;  %v2597_v39 = vpop.eup %2596 }
 0x167   :  { %v246_v37 = vmul.f32 0.03125, %v244_v36  ;;  %v251_v40 = vmul.f32 %v2597_v39, %v235_v22  ;;  %v282_v22 = vshrl.u32 %v265_v15, 7 }
 0x169   :  { %v248_v38 = vadd.f32 1e-12, %v246_v37  ;;  %v257_v44 = vmul.f32 %v2307_v41, %v251_v40  ;;  %v283_v26 = vsub.s32 %v280_v21, %v282_v22  ;;  %v398_v30 = vsub.s32 0, %v282_v22 }
 0x16b   :  { %2598 = vrsqrt.f32 %v248_v38  ;;  %v2975_v47 = vadd.f32 %v2308_v45, %v257_v44 }
 0x175   :  { %v2599_v42 = vpop.eup %2598 }
 0x176   :  { %v252_v43 = vmul.f32 %v2599_v42, %v236_v27  ;;  %v276_v27 = vsel %vm275_vm6, %v270_v24, %v274_v25 }
 0x177   :  { %v284_v28 = vrot.slane %v276_v27, %v283_v26 }
 0x178   :  { %v258_v46 = vmul.f32 %v2307_v41, %v252_v43 }
 0x179   :  { %v292_v29 = vrot.slane %v284_v28, %v283_v26  ;;  %v285_v37 = vcombine.high %v284_v28, %v284_v28 }
 0x17a   :  { %v2977_v48 = vadd.f32 %v2308_v45, %v258_v46 }
 0x17b   :  { %v399_v32 = vrot.slane %v292_v29, %v398_v30  ;;  %v299_v41 = vrot.slane %v285_v37, %v283_v26 }
 0x17c   :  { %v300_v49 = vpack.c.bf16 %v2977_v48, %v2975_v47 }
 0x17e   :  { %2426 = vmatmul.mubr.msk.bf16.vlgmr.msra.gmra.mrb[0].mxu0 %vm225_vm1, %v300_v49 }
 0x17f   :  { %2446 = vmatprep.mubr.msk.f32.mxu0 %vm2686_vm2, %v2685_v31 }
 0x251   :  { %v359_v51 = vpop.f32.mrb[0].mxu0 }
 0x252   :  { %v2987_v52 = vadd.f32 %v2311_v50, %v359_v51  ;;  %v2427_v53 = vpop.f32.mrb[1].mxu0 }
 0x253   :  { %v362_v54 = vpop.f32.mrb[2].mxu0 }
 0x254   :  { %385 = vrot.lane.b32.xlu1 %v2987_v52, %s2687_s15  ;;  %383 = vrot.lane.b32.xlu0 %v2987_v52, %s2688_s25  ;;  %v2428_v55 = vpop.f32.mrb[3].mxu0  ;;  %v2992_v56 = vadd.f32 %v2311_v50, %v362_v54  ;;  %v366_v57 = vmul.f32 0.35355338, %v2987_v52  ;;  %v403_v50 = vrot.slane %v299_v41, %v398_v30 }
 0x256   :  { %v367_v0 = vmul.f32 0.35355338, %v2992_v56 }
 0x258   :  { %387 = vrot.lane.b32.xlu1 %v2987_v52, %s2689_s20  ;;  %392 = vrot.lane.b32.xlu0 %v2992_v56, %s2687_s15 }
 0x25c   :  { %406 = vrot.lane.b32.xlu0 %v2987_v52, %s2690_s19  ;;  %390 = vrot.lane.b32.xlu1 %v2992_v56, %s2688_s25 }
 0x260   :  { %369 = vrot.lane.b32.xlu0 %v366_v57, %s2688_s25  ;;  %394 = vrot.lane.b32.xlu1 %v2992_v56, %s2689_s20 }
 0x264   :  { %373 = vrot.lane.b32.xlu0 %v366_v57, %s2689_s20  ;;  %371 = vrot.lane.b32.xlu1 %v366_v57, %s2687_s15 }
 0x268   :  { %711 = vrot.lane.b32.xlu1 %v2992_v56, %s2690_s19 }
 0x2c6   :  { %v3006_v58 = vpop.permute.xlu1 %385  ;;  %v3008_v59 = vpop.permute.xlu0 %383 }
 0x2c7   :  { %483 = vrot.lane.b32.xlu1 %v3008_v59, %s2690_s19 }
 0x2ca   :  { %v3011_v60 = vpop.permute.xlu1 %387  ;;  %v3013_v61 = vpop.permute.xlu0 %392 }
 0x2cb   :  { %635 = vrot.lane.b32.xlu0 %v3011_v60, %s2690_s19  ;;  %559 = vrot.lane.b32.xlu1 %v3006_v58, %s2690_s19 }
 0x2ce   :  { %v407_v62 = vpop.permute.xlu0 %406  ;;  %v3017_v63 = vpop.permute.xlu1 %390 }
 0x2cf   :  { %2430 = vmatpush3.xpose.msk.msra.mxu1 %vm408_vm3, %v407_v62  ;;  %787 = vrot.lane.b32.xlu0 %v3017_v63, %s2690_s19 }
 0x2d0   :  { %376 = vrot.lane.b32.xlu1 %v367_v0, %s2688_s25  ;;  %2434 = vmatprep.subr.mxu1 %v2685_v31 }
 0x2d2   :  { %2432 = vmatmul.mubr.msk.f32.vlgmr.msra.gmra.mrb[0].mxu1 %vm408_vm3, %v366_v57  ;;  %v3024_v1 = vpop.permute.xlu1 %394  ;;  %v370_v3 = vpop.permute.xlu0 %369 }
 0x2d3   :  { %863 = vrot.lane.b32.xlu0 %v3013_v61, %s2690_s19  ;;  %2436 = vmatprep.mubr.msk.f32.mxu1 %vm2686_vm2, %v2685_v31 }
 0x2d4   :  { %939 = vrot.lane.b32.xlu1 %v3024_v1, %s2690_s19 }
 0x2d6   :  { %v372_v2 = vpop.permute.xlu1 %371  ;;  %v374_v5 = vpop.permute.xlu0 %373 }
 0x2d7   :  { %378 = vrot.lane.b32.xlu0 %v367_v0, %s2687_s15 }
 0x2d8   :  { %380 = vrot.lane.b32.xlu1 %v367_v0, %s2689_s20 }
 0x2da   :  { %v712_v4 = vpop.permute.xlu1 %711 }
 0x339   :  { %v484_v6 = vpop.permute.xlu1 %483 }
 0x33a   :  { %2435 = vmatpush3.xpose.msk.msra.mxu1 %vm408_vm3, %v484_v6 }
 0x33b   :  { %2439 = vmatprep.subr.mxu1 %v2685_v31 }
 0x33d   :  { %v636_v7 = vpop.permute.xlu0 %635  ;;  %2437 = vmatmul.mubr.msk.f32.vlgmr.msra.gmra.mrb[2].mxu1 %vm408_vm3, %v370_v3  ;;  %v560_v8 = vpop.permute.xlu1 %559 }
 0x33e   :  { %2440 = vmatpush3.xpose.msk.msra.mxu1 %vm408_vm3, %v560_v8  ;;  %2445 = vmatpush3.xpose.msk.msra.mxu0 %vm408_vm3, %v636_v7 }
 0x33f   :  { %2441 = vmatprep.mubr.msk.f32.mxu1 %vm2686_vm2, %v2685_v31  ;;  %2454 = vmatprep.subr.mxu0 %v2685_v31 }
 0x340   :  { %2449 = vmatprep.subr.mxu1 %v2685_v31 }
 0x341   :  { %2447 = vmatmul.mubr.msk.f32.vlgmr.msra.gmra.mrb[4].mxu0 %vm408_vm3, %v374_v5  ;;  %v788_v9 = vpop.permute.xlu0 %787  ;;  %2442 = vmatmul.mubr.msk.f32.vlgmr.msra.gmra.mrb[4].mxu1 %vm408_vm3, %v372_v2 }
 0x342   :  { %v377_v10 = vpop.permute.xlu1 %376  ;;  %2450 = vmatpush3.xpose.msk.msra.mxu1 %vm408_vm3, %v712_v4  ;;  %2455 = vmatpush3.xpose.msk.msra.mxu0 %vm408_vm3, %v788_v9 }
 0x343   :  { %2451 = vmatprep.mubr.msk.f32.mxu1 %vm2686_vm2, %v2685_v31  ;;  %2456 = vmatprep.mubr.msk.f32.mxu0 %vm2686_vm2, %v2685_v31 }
 0x344   :  { %2464 = vmatprep.subr.mxu0 %v2685_v31  ;;  %2459 = vmatprep.subr.mxu1 %v2685_v31 }
 0x345   :  { %v864_v11 = vpop.permute.xlu0 %863  ;;  %2457 = vmatmul.mubr.msk.f32.vlgmr.msra.gmra.mrb[6].mxu0 %vm408_vm3, %v377_v10  ;;  %2452 = vmatmul.mubr.msk.f32.vlgmr.msra.gmra.mrb[6].mxu1 %vm408_vm3, %v367_v0 }
 0x346   :  { %v940_v12 = vpop.permute.xlu1 %939  ;;  %2460 = vmatpush3.xpose.msk.msra.mxu1 %vm408_vm3, %v864_v11  ;;  %2466 = vmatprep.mubr.msk.f32.mxu0 %vm2686_vm2, %v2685_v31 }
 0x347   :  { %2465 = vmatpush3.xpose.msk.msra.mxu0 %vm408_vm3, %v940_v12  ;;  %2461 = vmatprep.mubr.msk.f32.mxu1 %vm2686_vm2, %v2685_v31 }
 0x348   :  { %2474 = vmatprep.subr.mxu0 %v2685_v31  ;;  %2469 = vmatprep.subr.mxu1 %v2685_v31 }
 0x349   :  { %v379_v13 = vpop.permute.xlu0 %378 }
 0x34a   :  { %v381_v14 = vpop.permute.xlu1 %380  ;;  %2462 = vmatmul.mubr.msk.f32.vlgmr.msra.gmra.mrb[8].mxu1 %vm408_vm3, %v379_v13 }
 0x34b   :  { %2467 = vmatmul.mubr.msk.f32.vlgmr.msra.gmra.mrb[8].mxu0 %vm408_vm3, %v381_v14  ;;  %2471 = vmatprep.mubr.msk.f32.mxu1 %vm2686_vm2, %v2685_v31 }
 0x34c   :  { %2476 = vmatprep.mubr.msk.f32.mxu0 %vm2686_vm2, %v2685_v31 }
 0x3a5   :  { %v479_v33 = vpop.f32.mrb[0].mxu1 }
 0x3a6   :  { %v480_v34 = vadd.f32 %v479_v33, %v399_v32  ;;  %v2433_v35 = vpop.f32.mrb[1].mxu1 }
 0x3a8   :  { %v1015_v36 = vsel %vm408_vm3, %v480_v34, -inf }
 0x3a9   :  { %1016 = vmax.xlane.f32.xlu0 %v1015_v36 }
 0x410   :  { %v555_v38 = vpop.f32.mrb[2].mxu1 }
 0x411   :  { %v556_v39 = vadd.f32 %v555_v38, %v399_v32  ;;  %v2438_v40 = vpop.f32.mrb[3].mxu1 }
 0x413   :  { %v1018_v42 = vsel %vm408_vm3, %v556_v39, -inf }
 0x414   :  { %v631_v43 = vpop.f32.mrb[4].mxu1  ;;  %1019 = vmax.xlane.f32.xlu1 %v1018_v42  ;;  %v707_v44 = vpop.f32.mrb[4].mxu0 }
 0x415   :  { %v708_v45 = vadd.f32 %v707_v44, %v399_v32  ;;  %v2443_v46 = vpop.f32.mrb[5].mxu1  ;;  %v2448_v49 = vpop.f32.mrb[5].mxu0  ;;  %v632_v51 = vadd.f32 %v631_v43, %v399_v32 }
 0x417   :  { %v1024_v53 = vsel %vm408_vm3, %v708_v45, -inf  ;;  %v1021_v3 = vsel %vm408_vm3, %v632_v51, -inf }
 0x418   :  { %v783_v54 = vpop.f32.mrb[6].mxu1  ;;  %1025 = vmax.xlane.f32.xlu0 %v1024_v53  ;;  %v859_v55 = vpop.f32.mrb[6].mxu0 }
 0x419   :  { %v860_v57 = vadd.f32 %v859_v55, %v403_v50  ;;  %v2453_v62 = vpop.f32.mrb[7].mxu1  ;;  %v2458_v0 = vpop.f32.mrb[7].mxu0  ;;  %v784_v2 = vadd.f32 %v783_v54, %v403_v50 }
 0x41b   :  { %v1030_v4 = vsel %vm408_vm3, %v860_v57, -inf  ;;  %v1027_v11 = vsel %vm408_vm3, %v784_v2, -inf }
 0x41c   :  { %1022 = vmax.xlane.f32.xlu0 %v1021_v3  ;;  %1031 = vmax.xlane.f32.xlu1 %v1030_v4 }
 0x41d   :  { %v935_v5 = vpop.f32.mrb[8].mxu1 }
 0x41e   :  { %v1011_v6 = vpop.f32.mrb[8].mxu0  ;;  %v2463_v7 = vpop.f32.mrb[9].mxu1  ;;  %v936_v8 = vadd.f32 %v935_v5, %v403_v50 }
 0x41f   :  { %v1012_v9 = vadd.f32 %v1011_v6, %v403_v50  ;;  %v2468_v10 = vpop.f32.mrb[9].mxu0 }
 0x420   :  { %1028 = vmax.xlane.f32.xlu0 %v1027_v11  ;;  %v1033_v13 = vsel %vm408_vm3, %v936_v8, -inf }
 0x421   :  { %v1036_v12 = vsel %vm408_vm3, %v1012_v9, -inf }
 0x422   :  { %1037 = vmax.xlane.f32.xlu1 %v1036_v12 }
 0x424   :  { %1034 = vmax.xlane.f32.xlu0 %v1033_v13 }
 0x433   :  { %1179 = vrot.lane.b32.xlu1 %v3008_v59, %s2693_s16 }
 0x436   :  { %v1017_v14 = vpop.xlane.xlu0 %1016 }
 0x437   :  { %1255 = vrot.lane.b32.xlu1 %v3006_v58, %s2693_s16  ;;  %v1039_v15 = vsub.f32 %v480_v34, %v1017_v14 }
 0x439   :  { %v1047_v16 = vmul.f32 1.442695, %v1039_v15 }
 0x43a   :  { %1103 = vrot.lane.b32.xlu0 %v2987_v52, %s2693_s16 }
 0x43b   :  { %1331 = vrot.lane.b32.xlu1 %v3011_v60, %s2693_s16  ;;  %2600 = vpow2.f32 %v1047_v16 }
 0x43e   :  { %1407 = vrot.lane.b32.xlu0 %v2992_v56, %s2693_s16 }
 0x43f   :  { %1483 = vrot.lane.b32.xlu1 %v3017_v63, %s2693_s16 }
 0x445   :  { %v3088_v59 = vpop.eup %2600 }
 0x446   :  { %v1063_v58 = vsel %vm408_vm3, %v3088_v59, 0.0 }
 0x45d   :  { %1064 = vadd.xlane.f32.xlu0 %v1063_v58 }
 0x4a1   :  { %v1020_v52 = vpop.xlane.xlu1 %1019 }
 0x4a2   :  { %v1040_v17 = vsub.f32 %v556_v39, %v1020_v52 }
 0x4a4   :  { %v1049_v18 = vmul.f32 1.442695, %v1040_v17 }
 0x4a5   :  { %v1026_v60 = vpop.xlane.xlu0 %1025 }
 0x4a6   :  { %2602 = vpow2.f32 %v1049_v18  ;;  %v1042_v19 = vsub.f32 %v708_v45, %v1026_v60 }
 0x4a8   :  { %v1053_v56 = vmul.f32 1.442695, %v1042_v19 }
 0x4a9   :  { %v1023_v20 = vpop.xlane.xlu0 %1022  ;;  %v1032_v21 = vpop.xlane.xlu1 %1031 }
 0x4aa   :  { %2604 = vpow2.f32 %v1053_v56  ;;  %v1041_v63 = vsub.f32 %v632_v51, %v1023_v20  ;;  %v1044_v22 = vsub.f32 %v860_v57, %v1032_v21 }
 0x4ac   :  { %v1051_v23 = vmul.f32 1.442695, %v1041_v63  ;;  %v1057_v24 = vmul.f32 1.442695, %v1044_v22 }
 0x4ad   :  { %v1029_v25 = vpop.xlane.xlu0 %1028 }
 0x4ae   :  { %2606 = vpow2.f32 %v1051_v23  ;;  %v1043_v26 = vsub.f32 %v784_v2, %v1029_v25 }
 0x4af   :  { %2608 = vpow2.f32 %v1057_v24  ;;  %v1038_v27 = vpop.xlane.xlu1 %1037  ;;  %v2584_v24 = vld [vmem:[%s3251_s3] sm:$0xff]  }
 0x4b0   :  { %v2603_v28 = vpop.eup %2602  ;;  %v1055_v29 = vmul.f32 1.442695, %v1043_v26  ;;  %v1046_v30 = vsub.f32 %v1012_v9, %v1038_v27 }
 0x4b1   :  { %v1035_v32 = vpop.xlane.xlu0 %1034  ;;  %v1066_v33 = vsel %vm408_vm3, %v2603_v28, 0.0 }
 0x4b2   :  { %2610 = vpow2.f32 %v1055_v29  ;;  %v1061_v34 = vmul.f32 1.442695, %v1046_v30  ;;  %v1045_v35 = vsub.f32 %v936_v8, %v1035_v32  ;;  %1067 = vadd.xlane.f32.xlu1 %v1066_v33  ;;  %v2585_v29 = vld [vmem:[%s3251_s3 + $0x8] sm:$0xff]  }
 0x4b3   :  { %v1180_v36 = vpop.permute.xlu1 %1179 }
 0x4b4   :  { %v2605_v37 = vpop.eup %2604  ;;  %2612 = vpow2.f32 %v1061_v34  ;;  %v1059_v38 = vmul.f32 1.442695, %v1045_v35  ;;  %2475 = vmatpush3.msra.mxu0 %v1180_v36 }
 0x4b5   :  { %v1104_v39 = vpop.permute.xlu0 %1103  ;;  %v1072_v40 = vsel %vm408_vm3, %v2605_v37, 0.0  ;;  %2484 = vmatprep.subr.mxu0 %v2685_v31 }
 0x4b6   :  { %2614 = vpow2.f32 %v1059_v38  ;;  %2470 = vmatpush3.msra.mxu1 %v1104_v39  ;;  %1073 = vadd.xlane.f32.xlu1 %v1072_v40 }
 0x4b7   :  { %2479 = vmatprep.subr.mxu1 %v2685_v31  ;;  %v1256_v0 = vpop.permute.xlu1 %1255 }
 0x4b8   :  { %v2607_v41 = vpop.eup %2606 }
 0x4b9   :  { %v2609_v42 = vpop.eup %2608  ;;  %v1069_v43 = vsel %vm408_vm3, %v2607_v41, 0.0  ;;  %v1408_v54 = vpop.permute.xlu0 %1407 }
 0x4ba   :  { %1070 = vadd.xlane.f32.xlu0 %v1069_v43  ;;  %v1078_v44 = vsel %vm408_vm3, %v2609_v42, 0.0 }
 0x4bb   :  { %1079 = vadd.xlane.f32.xlu1 %v1078_v44  ;;  %v1332_v2 = vpop.permute.xlu1 %1331 }
 0x4bc   :  { %v2611_v45 = vpop.eup %2610 }
 0x4bd   :  { %v1075_v46 = vsel %vm408_vm3, %v2611_v45, 0.0 }
 0x4be   :  { %v2613_v49 = vpop.eup %2612  ;;  %1076 = vadd.xlane.f32.xlu0 %v1075_v46 }
 0x4bf   :  { %v1084_v50 = vsel %vm408_vm3, %v2613_v49, 0.0 }
 0x4c0   :  { %v3100_v51 = vpop.eup %2614  ;;  %1085 = vadd.xlane.f32.xlu1 %v1084_v50 }
 0x4c1   :  { %v1081_v53 = vsel %vm408_vm3, %v3100_v51, 0.0 }
 0x4c2   :  { %1082 = vadd.xlane.f32.xlu0 %v1081_v53 }
 0x4d1   :  { %1635 = vrot.lane.b32.xlu1 %v3024_v1, %s2693_s16  ;;  %v1484_v1 = vpop.permute.xlu1 %1483 }
 0x4d8   :  { %1559 = vrot.lane.b32.xlu0 %v3013_v61, %s2693_s16 }
 0x4ea   :  { %v1065_v55 = vpop.xlane.xlu0 %1064 }
 0x4eb   :  { %2616 = vrcp.f32 %v1065_v55 }
 0x4f5   :  { %v2617_v57 = vpop.eup %2616 }
 0x4f6   :  { %v1095_v62 = vmul.f32 %v2617_v57, %v3088_v59 }
 0x4f8   :  { %2472 = vmatmul.mubr.msk.f32.vlgmr.msra.gmra.mrb[10].mxu1 %vm408_vm3, %v1095_v62 }
 0x4f9   :  { %2480 = vmatpush3.msra.mxu1 %v1256_v0  ;;  %2481 = vmatprep.mubr.msk.f32.mxu1 %vm2686_vm2, %v2685_v31 }
 0x4fa   :  { %2489 = vmatprep.subr.mxu1 %v2685_v31 }
 0x53f   :  { %v1068_v3 = vpop.xlane.xlu1 %1067 }
 0x540   :  { %2618 = vrcp.f32 %v1068_v3 }
 0x543   :  { %v1074_v61 = vpop.xlane.xlu1 %1073 }
 0x544   :  { %2620 = vrcp.f32 %v1074_v61 }
 0x547   :  { %v1071_v4 = vpop.xlane.xlu0 %1070 }
 0x548   :  { %2622 = vrcp.f32 %v1071_v4  ;;  %v1080_v5 = vpop.xlane.xlu1 %1079 }
 0x549   :  { %2624 = vrcp.f32 %v1080_v5 }
 0x54a   :  { %v2619_v6 = vpop.eup %2618 }
 0x54b   :  { %v1096_v7 = vmul.f32 %v2619_v6, %v2603_v28  ;;  %v1077_v8 = vpop.xlane.xlu0 %1076 }
 0x54c   :  { %2626 = vrcp.f32 %v1077_v8 }
 0x54d   :  { %v1086_v9 = vpop.xlane.xlu1 %1085  ;;  %2477 = vmatmul.mubr.msk.f32.vlgmr.msra.gmra.mrb[10].mxu0 %vm408_vm3, %v1096_v7 }
 0x54e   :  { %v2621_v10 = vpop.eup %2620  ;;  %2628 = vrcp.f32 %v1086_v9  ;;  %2485 = vmatpush3.msra.mxu0 %v1332_v2  ;;  %2486 = vmatprep.mubr.msk.f32.mxu0 %vm2686_vm2, %v2685_v31 }
 0x54f   :  { %v1098_v11 = vmul.f32 %v2621_v10, %v2605_v37  ;;  %v1083_v12 = vpop.xlane.xlu0 %1082  ;;  %2494 = vmatprep.subr.mxu0 %v2685_v31 }
 0x550   :  { %2630 = vrcp.f32 %v1083_v12 }
 0x551   :  { %2487 = vmatmul.mubr.msk.f32.vlgmr.msra.gmra.mrb[12].mxu0 %vm408_vm3, %v1098_v11  ;;  %v1636_v58 = vpop.permute.xlu1 %1635 }
 0x552   :  { %v2623_v13 = vpop.eup %2622  ;;  %2495 = vmatpush3.msra.mxu0 %v1484_v1  ;;  %2496 = vmatprep.mubr.msk.f32.mxu0 %vm2686_vm2, %v2685_v31  ;;  %v2339_v1 = vld [vmem:[%s3255_s7 + $0x3] ss:$0 sm:$0xff] }
 0x553   :  { %v2625_v14 = vpop.eup %2624  ;;  %v1097_v15 = vmul.f32 %v2623_v13, %v2607_v41  ;;  %2504 = vmatprep.subr.mxu0 %v2685_v31  ;;  %v1560_v60 = vpop.permute.xlu0 %1559 }
 0x554   :  { %v1100_v16 = vmul.f32 %v2625_v14, %v2609_v42 }
 0x555   :  { %2482 = vmatmul.mubr.msk.f32.vlgmr.msra.gmra.mrb[12].mxu1 %vm408_vm3, %v1097_v15 }
 0x556   :  { %v2627_v59 = vpop.eup %2626  ;;  %2490 = vmatpush3.msra.mxu1 %v1408_v54  ;;  %2497 = vmatmul.mubr.msk.f32.vlgmr.msra.gmra.mrb[14].mxu0 %vm408_vm3, %v1100_v16 }
 0x557   :  { %v1099_v52 = vmul.f32 %v2627_v59, %v2611_v45  ;;  %2505 = vmatpush3.msra.mxu0 %v1636_v58  ;;  %2491 = vmatprep.mubr.msk.f32.mxu1 %vm2686_vm2, %v2685_v31 }
 0x558   :  { %v2629_v17 = vpop.eup %2628  ;;  %2499 = vmatprep.subr.mxu1 %v2685_v31  ;;  %2506 = vmatprep.mubr.msk.f32.mxu0 %vm2686_vm2, %v2685_v31 }
 0x559   :  { %v1102_v18 = vmul.f32 %v2629_v17, %v2613_v49  ;;  %2492 = vmatmul.mubr.msk.f32.vlgmr.msra.gmra.mrb[14].mxu1 %vm408_vm3, %v1099_v52  ;;  %2517 = vmatprep.subr.bf16.mxu0 %v2685_v31 }
 0x55a   :  { %v2631_v19 = vpop.eup %2630  ;;  %2500 = vmatpush3.msra.mxu1 %v1560_v60  ;;  %2501 = vmatprep.mubr.msk.f32.mxu1 %vm2686_vm2, %v2685_v31 }
 0x55b   :  { %v1101_v56 = vmul.f32 %v2631_v19, %v3100_v51  ;;  %2507 = vmatmul.mubr.msk.f32.vlgmr.msra.gmra.mrb[16].mxu0 %vm408_vm3, %v1102_v18  ;;  %2509 = vmatprep.subr.bf16.mxu1 %v2685_v31  ;;  %v2587_v18 = vld [vmem:[%s3252_s4 + $0x8] sm:$0xff]  }
 0x55c   :  { %2521 = vmatprep.mubr.msk.bf16.mxu0 %vm2686_vm2, %v2685_v31 }
 0x55d   :  { %2502 = vmatmul.mubr.msk.f32.vlgmr.msra.gmra.mrb[16].mxu1 %vm408_vm3, %v1101_v56 }
 0x55e   :  { %2513 = vmatprep.mubr.msk.bf16.mxu1 %vm2686_vm2, %v2685_v31  ;;  %2510 = vmatpush3.bf16.msra.mxu1 %v2584_v24  ;;  %v2343_v24 = vld [vmem:[%s3255_s7 + $0x4] ss:$0 sm:$0xff] }
 0x55f   :  { %2511 = vmatprep.subr.bf16.mxu1 %v2685_v31 }
 0x562   :  { %2512 = vmatpush3.bf16.msra.mxu1 %v2585_v29 }
 0x563   :  { %2525 = vmatprep.subr.bf16.mxu1 %v2685_v31 }
 0x5cb   :  { %v1175_v20 = vpop.f32.mrb[10].mxu1 }
 0x5cc   :  { %v2473_v21 = vpop.f32.mrb[11].mxu1 }
 0x620   :  { %v1251_v63 = vpop.f32.mrb[10].mxu0 }
 0x621   :  { %v2478_v22 = vpop.f32.mrb[11].mxu0 }
 0x624   :  { %v1403_v23 = vpop.f32.mrb[12].mxu0 }
 0x625   :  { %v2488_v25 = vpop.f32.mrb[13].mxu0 }
 0x628   :  { %v1327_v26 = vpop.f32.mrb[12].mxu1 }
 0x629   :  { %v1555_v27 = vpop.f32.mrb[14].mxu0  ;;  %v2483_v28 = vpop.f32.mrb[13].mxu1 }
 0x62a   :  { %v2567_v30 = vpack.i.bf16 %v1555_v27, %v1251_v63  ;;  %v2498_v32 = vpop.f32.mrb[15].mxu0  ;;  %v2344_v28 = vld [vmem:[%s3255_s7 + $0x5] ss:$0 sm:$0xff] }
 0x62c   :  { %2568 = vrot.lane.b32.xlu0 %v2567_v30, %s2694_s10  ;;  %v1479_v33 = vpop.f32.mrb[14].mxu1 }
 0x62d   :  { %v2493_v34 = vpop.f32.mrb[15].mxu1 }
 0x62e   :  { %v1707_v35 = vpop.f32.mrb[16].mxu0  ;;  %v2588_v34 = vld [vmem:[%s3253_s5] sm:$0xff]  }
 0x62f   :  { %v2577_v36 = vpack.i.bf16 %v1707_v35, %v1403_v23  ;;  %v2508_v37 = vpop.f32.mrb[17].mxu0  ;;  %v2589_v35 = vld [vmem:[%s3253_s5 + $0x8] sm:$0xff]  }
 0x630   :  { %v1631_v38 = vpop.f32.mrb[16].mxu1  ;;  %v2591_v37 = vld [vmem:[%s3253_s5 + $0x18] sm:$0xff]  }
 0x631   :  { %v2572_v39 = vpack.i.bf16 %v1631_v38, %v1327_v26  ;;  %2578 = vrot.lane.b32.xlu0 %v2577_v36, %s2695_s30  ;;  %v2503_v40 = vpop.f32.mrb[17].mxu1  ;;  %v2590_v36 = vld [vmem:[%s3253_s5 + $0x10] sm:$0xff]   ;;  %v2345_v38 = vld [vmem:[%s3255_s7 + $0x6] ss:$0 sm:$0xff] }
 0x633   :  { %2573 = vrot.lane.b32.xlu1 %v2572_v39, %s2696_s28 }
 0x69e   :  { %v2569_v41 = vpop.permute.xlu0 %2568 }
 0x69f   :  { %v2571_v42 = vunpack.i.h.bf16 %v2569_v41  ;;  %v2570_v43 = vunpack.i.l.bf16 %v2569_v41 }
 0x6a1   :  { %v1740_v50 = vsel %vm408_vm3, %v1479_v33, %v2571_v42  ;;  %v1723_v51 = vsel %vm408_vm3, %v1175_v20, %v2570_v43 }
 0x6a3   :  { %v2579_v44 = vpop.permute.xlu0 %2578 }
 0x6a4   :  { %v2581_v53 = vunpack.i.h.bf16 %v2579_v44  ;;  %v2580_v54 = vunpack.i.l.bf16 %v2579_v44 }
 0x6a5   :  { %v2574_v45 = vpop.permute.xlu1 %2573 }
 0x6a6   :  { %v2576_v46 = vunpack.i.h.bf16 %v2574_v45  ;;  %v2575_v49 = vunpack.i.l.bf16 %v2574_v45 }
 0x6a8   :  { %v1725_v55 = vsel %vm1724_vm7, %v1723_v51, %v2575_v49  ;;  %v1741_v57 = vsel %vm1724_vm7, %v1740_v50, %v2576_v46 }
 0x6a9   :  { %v1727_v62 = vsel %vm1726_vm8, %v1725_v55, %v2580_v54  ;;  %v1742_v0 = vsel %vm1726_vm8, %v1741_v57, %v2581_v53 }
 0x6aa   :  { %v1743_v2 = vpack.c.bf16 %v1742_v0, %v1727_v62 }
 0x6ac   :  { %2514 = vmatmul.mubr.msk.bf16.vlgmr.msra.gmra.mrb[20].mxu1 %vm225_vm1, %v1743_v2 }
 0x6ad   :  { %2533 = vmatprep.mubr.msk.bf16.mxu1 %vm2686_vm2, %v2685_v31  ;;  %2526 = vmatpush3.bf16.msra.mxu1 %v2588_v34 }
 0x6ae   :  { %2527 = vmatprep.subr.bf16.mxu1 %v2685_v31 }
 0x6b1   :  { %2528 = vmatpush3.bf16.msra.mxu1 %v2589_v35 }
 0x6b2   :  { %2529 = vmatprep.subr.bf16.mxu1 %v2685_v31 }
 0x6b5   :  { %2530 = vmatpush3.bf16.msra.mxu1 %v2590_v36 }
 0x6b6   :  { %2531 = vmatprep.subr.bf16.mxu1 %v2685_v31 }
 0x6b9   :  { %2532 = vmatpush3.bf16.msra.mxu1 %v2591_v37  ;;  %v2356_v37 = vld [vmem:[%s3255_s7 + $0x9] ss:$0 sm:$0xff] }
 0x77f   :  { %v1802_v3 = vpop.f32.mrb[20].mxu1 }
 0x780   :  { %v1803_v61 = vadd.f32 %v2339_v1, %v1802_v3  ;;  %v2515_v4 = vpop.f32.mrb[21].mxu1 }
 0x781   :  { %v1805_v5 = vpop.f32.mrb[22].mxu1 }
 0x782   :  { %v1806_v6 = vadd.f32 %v2339_v1, %v1805_v5  ;;  %v2516_v7 = vpop.f32.mrb[23].mxu1  ;;  %v1809_v8 = vadd.f32 %v1803_v61, %v2975_v47 }
 0x784   :  { %v1813_v9 = vsel %vm225_vm1, %v1809_v8, 0.0  ;;  %v1810_v10 = vadd.f32 %v1806_v6, %v2977_v48  ;;  %v2586_v48 = vld [vmem:[%s3252_s4] sm:$0xff]  }
 0x785   :  { %1814 = vadd.xlane.f32.xlu1 %v1813_v9  ;;  %2518 = vmatpush3.bf16.msra.mxu0 %v2586_v48 }
 0x786   :  { %v1816_v11 = vsel %vm225_vm1, %v1810_v10, 0.0  ;;  %2519 = vmatprep.subr.bf16.mxu0 %v2685_v31 }
 0x787   :  { %1817 = vadd.xlane.f32.xlu0 %v1816_v11 }
 0x789   :  { %2520 = vmatpush3.bf16.msra.mxu0 %v2587_v18 }
 0x78a   :  { %2537 = vmatprep.subr.bf16.mxu0 %v2685_v31 }
 0x812   :  { %v1815_v12 = vpop.xlane.xlu1 %1814 }
 0x813   :  { %v1819_v13 = vmul.f32 0.03125, %v1815_v12 }
 0x814   :  { %v1818_v14 = vpop.xlane.xlu0 %1817 }
 0x815   :  { %v1821_v15 = vsub.f32 %v1809_v8, %v1819_v13  ;;  %v1820_v16 = vmul.f32 0.03125, %v1818_v14  ;;  %v2349_v8 = vld [vmem:[%s3255_s7 + $0x7] ss:$0 sm:$0xff] }
 0x817   :  { %v1822_v59 = vsub.f32 %v1810_v10, %v1820_v16  ;;  %v1823_v58 = vmul.f32 %v1821_v15, %v1821_v15 }
 0x819   :  { %v1825_v52 = vsel %vm225_vm1, %v1823_v58, 0.0  ;;  %v1824_v17 = vmul.f32 %v1822_v59, %v1822_v59 }
 0x81a   :  { %1826 = vadd.xlane.f32.xlu0 %v1825_v52 }
 0x81b   :  { %v1828_v47 = vsel %vm225_vm1, %v1824_v17, 0.0 }
 0x81e   :  { %1829 = vadd.xlane.f32.xlu0 %v1828_v47 }
 0x8a7   :  { %v1827_v60 = vpop.xlane.xlu0 %1826 }
 0x8a8   :  { %v1831_v19 = vmul.f32 0.03125, %v1827_v60 }
 0x8aa   :  { %v1833_v56 = vadd.f32 1e-12, %v1831_v19 }
 0x8ab   :  { %v1830_v20 = vpop.xlane.xlu0 %1829 }
 0x8ac   :  { %2632 = vrsqrt.f32 %v1833_v56  ;;  %v1832_v21 = vmul.f32 0.03125, %v1830_v20 }
 0x8ae   :  { %v1834_v63 = vadd.f32 1e-12, %v1832_v21 }
 0x8b0   :  { %2634 = vrsqrt.f32 %v1834_v63  ;;  %v2592_v63 = vld [vmem:[%s3251_s3 + $0x10] sm:$0xff]  }
 0x8b6   :  { %v2633_v22 = vpop.eup %2632 }
 0x8b7   :  { %v1837_v23 = vmul.f32 %v2633_v22, %v1821_v15  ;;  %v2593_v22 = vld [vmem:[%s3251_s3 + $0x18] sm:$0xff]  }
 0x8b9   :  { %v1843_v26 = vmul.f32 %v2343_v24, %v1837_v23 }
 0x8ba   :  { %v2635_v25 = vpop.eup %2634 }
 0x8bb   :  { %v1838_v27 = vmul.f32 %v2635_v25, %v1822_v59  ;;  %v1849_v30 = vadd.f32 %v2344_v28, %v1843_v26 }
 0x8bd   :  { %v1844_v29 = vmul.f32 %v2343_v24, %v1838_v27 }
 0x8bf   :  { %v1850_v32 = vadd.f32 %v2344_v28, %v1844_v29 }
 0x8c1   :  { %v1851_v33 = vpack.c.bf16 %v1850_v32, %v1849_v30 }
 0x8c3   :  { %2522 = vmatmul.mubr.msk.bf16.vlgmr.msra.gmra.mrb[20].mxu0 %vm225_vm1, %v1851_v33  ;;  %v2355_v33 = vld [vmem:[%s3255_s7 + $0x8] ss:$0 sm:$0xff] }
 0x8c4   :  { %2541 = vmatprep.mubr.msk.bf16.mxu0 %vm2686_vm2, %v2685_v31  ;;  %2538 = vmatpush3.bf16.msra.mxu0 %v2592_v63 }
 0x8c5   :  { %2539 = vmatprep.subr.bf16.mxu0 %v2685_v31 }
 0x8c8   :  { %2540 = vmatpush3.bf16.msra.mxu0 %v2593_v22 }
 0x8c9   :  { %2545 = vmatprep.subr.bf16.mxu0 %v2685_v31 }
 0x996   :  { %v1910_v39 = vpop.f32.mrb[20].mxu0 }
 0x997   :  { %v1911_v40 = vadd.f32 %v2345_v38, %v1910_v39  ;;  %v2523_v41 = vpop.f32.mrb[21].mxu0 }
 0x998   :  { %v1913_v42 = vpop.f32.mrb[22].mxu0 }
 0x999   :  { %v1917_v43 = vmul.f32 %v1911_v40, %v1911_v40  ;;  %v1914_v44 = vadd.f32 %v2345_v38, %v1913_v42  ;;  %v2524_v45 = vpop.f32.mrb[23].mxu0 }
 0x99a   :  { %v2361_v45 = vld [vmem:[%s3255_s7 + $0xa] ss:$0 sm:$0xff] }
 0x99b   :  { %v1919_v46 = vmul.f32 %v1917_v43, %v1911_v40  ;;  %v1918_v49 = vmul.f32 %v1914_v44, %v1914_v44  ;;  %v2594_v43 = vld [vmem:[%s3254_s6] sm:$0xff]  }
 0x99d   :  { %v1921_v50 = vmul.f32 0.044715, %v1919_v46  ;;  %v1920_v51 = vmul.f32 %v1918_v49, %v1914_v44 }
 0x99f   :  { %v1923_v53 = vadd.f32 %v1921_v50, %v1911_v40  ;;  %v1922_v54 = vmul.f32 0.044715, %v1920_v51 }
 0x9a1   :  { %v1925_v55 = vmul.f32 0.7978846, %v1923_v53  ;;  %v1924_v57 = vadd.f32 %v1922_v54, %v1914_v44 }
 0x9a3   :  { %2636 = vtanh.f32 %v1925_v55  ;;  %v1926_v62 = vmul.f32 0.7978846, %v1924_v57 }
 0x9a5   :  { %2638 = vtanh.f32 %v1926_v62 }
 0x9ad   :  { %v2637_v0 = vpop.eup %2636 }
 0x9ae   :  { %v1929_v2 = vadd.f32 1.0, %v2637_v0 }
 0x9af   :  { %v2639_v1 = vpop.eup %2638 }
 0x9b0   :  { %v1931_v3 = vmul.f32 0.5, %v1929_v2  ;;  %v1930_v61 = vadd.f32 1.0, %v2639_v1 }
 0x9b2   :  { %v1932_v4 = vmul.f32 0.5, %v1930_v61  ;;  %v1933_v5 = vmul.f32 %v1931_v3, %v1911_v40 }
 0x9b4   :  { %v1934_v6 = vmul.f32 %v1932_v4, %v1914_v44  ;;  %v2595_v44 = vld [vmem:[%s3254_s6 + $0x8] sm:$0xff]   ;;  %s2697_s6 = smov [#allocation6]  }
 0x9b5   :  { %s2203_s17 = sshll.u32 %s2697_s6, 4  ;;  %s2204_s17 = int_to_ptr.vmem [resolvable:$true] %s2203_s17 }
 0x9b6   :  { %v1935_v7 = vpack.c.bf16 %v1934_v6, %v1933_v5  ;;  %s2658_s26 = scalar_lea.vmem %s2204_s17, 32  ;;  %p2663_p6 = scmp.lt.s32.totalorder %s2204_s17, %s2204_s17 }
 0x9b7   :  { %p2659_p5 = scmp.ne.s32.totalorder %s2204_s17, %s2658_s26  ;;  %p2664_p7 = scmp.lt.s32.totalorder %s2658_s26, %s2658_s26 }
 0x9b8   :  { %2534 = vmatmul.mubr.msk.bf16.vlgmr.msra.gmra.mrb[24].mxu1 %vm1973_vm9, %v1935_v7 }
 0x9b9   :  { %p2665_p8 = por %p2664_p7, %p2663_p6 }
 0x9bb   :  { %p2666_p9 = pnand %p2665_p8, %p2659_p5 }
 0xa8b   :  { %v2011_v9 = vpop.f32.mrb[24].mxu1 }
 0xa8c   :  { %v2012_v10 = vadd.f32 %v2349_v8, %v2011_v9  ;;  %v2535_v11 = vpop.f32.mrb[25].mxu1 }
 0xa8d   :  { %v2014_v12 = vpop.f32.mrb[26].mxu1 }
 0xa8e   :  { %v2015_v13 = vadd.f32 %v2349_v8, %v2014_v12  ;;  %v2536_v14 = vpop.f32.mrb[27].mxu1  ;;  %v2018_v15 = vadd.f32 %v2012_v10, %v1849_v30 }
 0xa90   :  { %v2022_v16 = vsel %vm225_vm1, %v2018_v15, 0.0  ;;  %v2019_v59 = vadd.f32 %v2015_v13, %v1850_v32 }
 0xa91   :  { %2023 = vadd.xlane.f32.xlu0 %v2022_v16 }
 0xa92   :  { %v2025_v58 = vsel %vm225_vm1, %v2019_v59, 0.0 }
 0xa93   :  { %2026 = vadd.xlane.f32.xlu1 %v2025_v58 }
 0xb1e   :  { %v2024_v52 = vpop.xlane.xlu0 %2023 }
 0xb1f   :  { %v2028_v17 = vmul.f32 0.03125, %v2024_v52 }
 0xb20   :  { %v2027_v47 = vpop.xlane.xlu1 %2026 }
 0xb21   :  { %v2030_v48 = vsub.f32 %v2018_v15, %v2028_v17  ;;  %v2029_v18 = vmul.f32 0.03125, %v2027_v47 }
 0xb23   :  { %v2031_v60 = vsub.f32 %v2019_v59, %v2029_v18  ;;  %v2032_v19 = vmul.f32 %v2030_v48, %v2030_v48 }
 0xb25   :  { %v2034_v56 = vsel %vm225_vm1, %v2032_v19, 0.0  ;;  %v2033_v20 = vmul.f32 %v2031_v60, %v2031_v60 }
 0xb26   :  { %2035 = vadd.xlane.f32.xlu0 %v2034_v56 }
 0xb27   :  { %v2037_v21 = vsel %vm225_vm1, %v2033_v20, 0.0 }
 0xb28   :  { %2038 = vadd.xlane.f32.xlu1 %v2037_v21 }
 0xbb3   :  { %v2036_v23 = vpop.xlane.xlu0 %2035 }
 0xbb4   :  { %v2040_v24 = vmul.f32 0.03125, %v2036_v23 }
 0xbb5   :  { %v2039_v25 = vpop.xlane.xlu1 %2038 }
 0xbb6   :  { %v2042_v26 = vadd.f32 1e-12, %v2040_v24  ;;  %v2041_v27 = vmul.f32 0.03125, %v2039_v25 }
 0xbb8   :  { %2640 = vrsqrt.f32 %v2042_v26  ;;  %v2043_v28 = vadd.f32 1e-12, %v2041_v27 }
 0xbba   :  { %2642 = vrsqrt.f32 %v2043_v28 }
 0xbc2   :  { %v2641_v29 = vpop.eup %2640 }
 0xbc3   :  { %v2046_v30 = vmul.f32 %v2641_v29, %v2030_v48 }
 0xbc4   :  { %v2643_v32 = vpop.eup %2642 }
 0xbc5   :  { %v2047_v34 = vmul.f32 %v2643_v32, %v2031_v60  ;;  %v2052_v35 = vmul.f32 %v2355_v33, %v2046_v30 }
 0xbc7   :  { %v2053_v36 = vmul.f32 %v2355_v33, %v2047_v34  ;;  %v2058_v39 = vadd.f32 %v2356_v37, %v2052_v35 }
 0xbc9   :  { %v2059_v38 = vadd.f32 %v2356_v37, %v2053_v36 }
 0xbcb   :  { %v2061_v40 = vrot.slane %v2059_v38, 7 }
 0xbcd   :  { %v2063_v41 = vsel %vm275_vm6, %v2058_v39, %v2061_v40 }
 0xbce   :  { %v2064_v42 = vpack.c.bf16 %v2063_v41, %v2063_v41 }
 0xbd0   :  { %2542 = vmatmul.mubr.msk.bf16.vlgmr.msra.gmra.mrb[24].mxu0 %vm225_vm1, %v2064_v42 }
 0xbd1   :  { %2549 = vmatprep.mubr.msk.bf16.mxu0 %vm2686_vm2, %v2685_v31  ;;  %2546 = vmatpush3.bf16.msra.mxu0 %v2594_v43 }
 0xbd2   :  { %2547 = vmatprep.subr.bf16.mxu0 %v2685_v31  ;;  %v2365_v31 = vld [vmem:[%s3255_s7 + $0xb] ss:$0 sm:$0xff] }
 0xbd5   :  { %2548 = vmatpush3.bf16.msra.mxu0 %v2595_v44 }
 0xca3   :  { %v2124_v46 = vpop.f32.mrb[24].mxu0 }
 0xca4   :  { %v2125_v49 = vadd.f32 %v2361_v45, %v2124_v46  ;;  %v2543_v50 = vpop.f32.mrb[25].mxu0 }
 0xca5   :  { %v2127_v51 = vpop.f32.mrb[26].mxu0 }
 0xca6   :  { %2644 = vtanh.f32 %v2125_v49  ;;  %v2544_v53 = vpop.f32.mrb[27].mxu0 }
 0xcb0   :  { %v2645_v54 = vpop.eup %2644 }
 0xcb1   :  { %v2131_v55 = vpack.c.bf16 %v2645_v54, %v2645_v54 }
 0xcb3   :  { %2550 = vmatmul.mubr.msk.bf16.vlgmr.msra.gmra.mrb[28].mxu0 %vm225_vm1, %v2131_v55 }
 0xd86   :  { %v2190_v57 = vpop.f32.mrb[28].mxu0 }
 0xd87   :  { %v2191_v62 = vadd.f32 %v2365_v31, %v2190_v57  ;;  %v2551_v0 = vpop.f32.mrb[29].mxu0 }
 0xd88   :  { %v2193_v2 = vpop.f32.mrb[30].mxu0 }
 0xd89   :  { %2196 = vst [vmem:[#allocation6] sm:$0x3] %v2191_v62  ;;  %v2552_v1 = vpop.f32.mrb[31].mxu0 }
 0xd8a   :  { %2669 = shalt.err (!%p2666_p9)
}
 0xd8b   :  { %s3259_s15 = sld [smem:[#allocation9_spill]] }
 0xd91   :  { %s2670_s7 = scalar_lea.hbm %s3259_s15, 32 }
 0xd92   :  { %p2671_p10 = scmp.ne.s32.totalorder %s3259_s15, %s2670_s7  ;;  %p2674_p11 = scmp.lt.u32.totalorder %s2670_s7, %s3259_s15 }
 0xd94   :  { %p2676_p12 = pnand %p2674_p11, %p2671_p10 }
 0xd96   :  { %2679 = shalt.err (!%p2676_p12)
}
 0xd97   :  { %2206 = dma.vmem_to_hbm [thread:$0]  %s2204_s17, 32, %s3259_s15, [#allocation4]  }
 0xd98   :  { %2682 = dma.done.wait [#allocation4], 32  }
 0xd99   :  { %2683 = vsyncadd [#allocation4], 4294967264 }
 0xd9a   :  { %2210 = vsyncpa [#allocation4], 1 }
 0xd9b   :  { %2211 = vsyncpa [#allocation5], 1 }

</bundles_post_ra>
